<compile_context>
chip_gen: v6e
topology: v6e:2x2x1
jax: 0.10.0
libtpu: 0.0.40
codegen_flags: <defaults>
</compile_context>

<pallas_src>
import functools

import jax
import jax.numpy as jnp
from jax.experimental import pallas as pl
from jax.experimental.pallas import tpu as pltpu


# ----------------------------------------------------------------------------
# Fused Pallas kernel: 3 x (GATConv + ReLU) -> mean pool -> Linear/ReLU/Linear
# ----------------------------------------------------------------------------
def _gcn_fused_kernel(x_ref, mask_ref,
                      w1_ref, as1_ref, ad1_ref, b1_ref,
                      w2_ref, as2_ref, ad2_ref, b2_ref,
                      w3_ref, as3_ref, ad3_ref, b3_ref,
                      pool_ref, lw1_ref, lb1_ref, lw2_ref, lb2_ref,
                      out_ref):
    """All shapes are pre-padded in the wrapper:

    x_ref   : (N, Fp)    node features (Fp = 128-padded input features)
    mask_ref: (N, N)     mask[i, j] != 0 iff edge j->i exists (incl. self loop)
    wK_ref  : (*, Hp)    bf16 GAT linear weights, Hp = 128-padded hidden
    asK/adK : (1, Hp)    attention vectors (f32)
    bK_ref  : (1, Hp)    GAT output bias (f32)
    pool_ref: (Bp, N)    mean-pool matrix (Bp = 8-padded #graphs)
    lw1_ref : (Hp, 1024) bf16, lb1_ref: (1, 1024)
    lw2_ref : (1024, Cp) bf16, lb2_ref: (1, Cp)   (Cp = 128-padded #classes)
    out_ref : (Bp, Cp)   logits (padded; sliced in the wrapper)
    """
    adj = mask_ref[...] > 0.0                                   # (N, N) bool

    def gat(h_in, w_bf16, a_src, a_dst, bias):
        # Linear projection on the MXU (bf16 operands, f32 accumulate).
        h = jnp.dot(h_in.astype(jnp.bfloat16), w_bf16,
                    preferred_element_type=jnp.float32)         # (N, Hp) f32
        # Per-node attention scores; contract the feature axis of h directly
        # (same lowering as the q.k^T einsum) -> no column transpose needed.
        s_dst = jax.lax.dot_general(h, a_dst, (((1,), (1,)), ((), ())),
                                    preferred_element_type=jnp.float32)  # (N,1)
        s_src = jax.lax.dot_general(a_src, h, (((1,), (1,)), ((), ())),
                                    preferred_element_type=jnp.float32)  # (1,N)
        # e[i, j] = LeakyReLU(s_dst[i] + s_src[j])  for edge j -> i   (f32)
        e = s_dst + s_src                                       # (N, N)
        e = jnp.where(e > 0, e, 0.2 * e)                        # LeakyReLU(0.2)
        e = jnp.where(adj, e, jnp.float32(-1e30))
        # Masked softmax over incoming edges (row-wise), kept in f32.
        e = e - jnp.max(e, axis=-1, keepdims=True)
        p = jnp.where(adj, jnp.exp(e), 0.0)                     # (N, N)
        denom = jnp.maximum(jnp.sum(p, axis=-1, keepdims=True),
                            jnp.float32(1e-20))                 # NaN guard
        inv = pl.reciprocal(denom, approx=True)                 # EUP (free slot)
        # Aggregate neighbours on the MXU; normalization deferred to a cheap
        # (N, Hp) multiply instead of an (N, N) divide.
        agg = jnp.dot(p.astype(jnp.bfloat16), h.astype(jnp.bfloat16),
                      preferred_element_type=jnp.float32)       # (N, Hp)
        return jnp.maximum(agg * inv + bias, 0.0)               # fused ReLU

    h = gat(x_ref[...], w1_ref[...], as1_ref[...], ad1_ref[...], b1_ref[...])
    h = gat(h, w2_ref[...], as2_ref[...], ad2_ref[...], b2_ref[...])
    h = gat(h, w3_ref[...], as3_ref[...], ad3_ref[...], b3_ref[...])

    # global_mean_pool as a (Bp, N) @ (N, Hp) matmul, then the 2-layer MLP head.
    pooled = jnp.dot(pool_ref[...].astype(jnp.bfloat16),
                     h.astype(jnp.bfloat16),
                     preferred_element_type=jnp.float32)        # (Bp, Hp)
    hid = jnp.dot(pooled.astype(jnp.bfloat16), lw1_ref[...],
                  preferred_element_type=jnp.float32) + lb1_ref[...]
    hid = jnp.maximum(hid, 0.0)
    out_ref[...] = (jnp.dot(hid.astype(jnp.bfloat16), lw2_ref[...],
                            preferred_element_type=jnp.float32) + lb2_ref[...])


_VMEM = pl.BlockSpec(memory_space=pltpu.MemorySpace.VMEM)


# ----------------------------------------------------------------------------
# Helpers
# ----------------------------------------------------------------------------
def _round_up(v, m):
    return ((v + m - 1) // m) * m


def _pad2(a, rows, cols):
    return jnp.pad(a, ((0, rows - a.shape[0]), (0, cols - a.shape[1])))


def build_adj_mask(edge_index, num_nodes):
    """mask[i, j] = 1 iff edge j -> i exists, plus self-loops (PyG default)."""
    src, dst = edge_index[0], edge_index[1]
    mask = jnp.zeros((num_nodes, num_nodes), jnp.float32)
    mask = mask.at[dst, src].set(1.0)
    mask = mask + jnp.eye(num_nodes, dtype=jnp.float32)
    return jnp.minimum(mask, 1.0)


def build_pool_matrix(batch, num_graphs):
    onehot = (batch[None, :] == jnp.arange(num_graphs)[:, None]).astype(jnp.float32)
    counts = jnp.maximum(onehot.sum(axis=1, keepdims=True), 1.0)
    return onehot / counts


def init_params(key, hidden_channels=32, num_node_features=5, num_classes=10):
    def glorot(key, shape):
        fan_in, fan_out = shape[0], shape[-1]
        scale = jnp.sqrt(6.0 / (fan_in + fan_out))
        return jax.random.uniform(key, shape, jnp.float32, -scale, scale)

    keys = jax.random.split(key, 16)
    params = {}
    dims = [(num_node_features, hidden_channels),
            (hidden_channels, hidden_channels),
            (hidden_channels, hidden_channels)]
    for i, (fi, fo) in enumerate(dims):
        params[f"conv{i + 1}"] = {
            "w": glorot(keys[4 * i + 0], (fi, fo)),
            "a_src": glorot(keys[4 * i + 1], (1, fo)),
            "a_dst": glorot(keys[4 * i + 2], (1, fo)),
            "bias": jnp.zeros((1, fo), jnp.float32),
        }
    params["lin1_w"] = glorot(keys[12], (hidden_channels, 1024))
    params["lin1_b"] = jnp.zeros((1, 1024), jnp.float32)
    params["lin2_w"] = glorot(keys[13], (1024, num_classes))
    params["lin2_b"] = jnp.zeros((1, num_classes), jnp.float32)
    return params


# ----------------------------------------------------------------------------
# Forward: pad to lane/sublane-dense shapes and call the single fused kernel
# ----------------------------------------------------------------------------
@functools.partial(jax.jit, static_argnums=(4,))
def gcn_forward(params, x, edge_index, batch, num_graphs):
    n, f_in = x.shape
    hidden = params["conv1"]["w"].shape[1]
    n_classes = params["lin2_w"].shape[1]
    mlp_hidden = params["lin1_w"].shape[1]

    n_pad = _round_up(n, 8)
    b_pad = _round_up(num_graphs, 8)
    f_pad = _round_up(f_in, 128)
    h_pad = _round_up(hidden, 128)
    c_pad = _round_up(n_classes, 128)

    mask = build_adj_mask(edge_index, n)
    pool = build_pool_matrix(batch, num_graphs)

    x_p = _pad2(x, n_pad, f_pad)
    mask_p = _pad2(mask, n_pad, n_pad)     # padded nodes: no edges -> excluded
    pool_p = _pad2(pool, b_pad, n_pad)

    conv_args = []
    in_dims = [f_pad, h_pad, h_pad]
    for i, name in enumerate(("conv1", "conv2", "conv3")):
        p = params[name]
        conv_args += [
            _pad2(p["w"], in_dims[i], h_pad).astype(jnp.bfloat16),  # MXU operand
            _pad2(p["a_src"], 1, h_pad),
            _pad2(p["a_dst"], 1, h_pad),
            _pad2(p["bias"], 1, h_pad),
        ]

    lw1 = _pad2(params["lin1_w"], h_pad, mlp_hidden).astype(jnp.bfloat16)
    lb1 = params["lin1_b"]                                  # (1, 1024) lane-dense
    lw2 = _pad2(params["lin2_w"], mlp_hidden, c_pad).astype(jnp.bfloat16)
    lb2 = _pad2(params["lin2_b"], 1, c_pad)

    args = [x_p, mask_p] + conv_args + [pool_p, lw1, lb1, lw2, lb2]

    # Advisory cost estimate so XLA overlaps mask/pool construction with the
    # kernel's weight DMAs.
    flops = (3 * (2 * n_pad * h_pad * h_pad + 2 * n_pad * n_pad * h_pad
                  + 4 * n_pad * h_pad)
             + 2 * b_pad * n_pad * h_pad
             + 2 * b_pad * h_pad * mlp_hidden
             + 2 * b_pad * mlp_hidden * c_pad)
    transcendentals = 3 * (n_pad * n_pad + n_pad)
    bytes_accessed = (sum(a.size * a.dtype.itemsize for a in args)
                      + b_pad * c_pad * 4)

    out_p = pl.pallas_call(
        _gcn_fused_kernel,
        out_shape=jax.ShapeDtypeStruct((b_pad, c_pad), jnp.float32),
        in_specs=[_VMEM] * len(args),
        out_specs=_VMEM,
        cost_estimate=pl.CostEstimate(flops=flops,
                                      transcendentals=transcendentals,
                                      bytes_accessed=bytes_accessed),
    )(*args)

    return out_p[:num_graphs, :n_classes]


# ----------------------------------------------------------------------------
if __name__ == "__main__":
    key = jax.random.PRNGKey(0)
    k_param, k_x = jax.random.split(key)

    hidden_channels = 32
    num_node_features = 5
    num_classes = 10
    num_nodes = 8       # two graphs of 4 nodes each
    num_graphs = 2

    params = init_params(k_param, hidden_channels, num_node_features, num_classes)

    x = jax.random.normal(k_x, (num_nodes, num_node_features), jnp.float32)

    # Two small ring graphs (directed edges both ways), nodes 0-3 and 4-7.
    src = jnp.array([0, 1, 1, 2, 2, 3, 3, 0, 4, 5, 5, 6, 6, 7, 7, 4], jnp.int32)
    dst = jnp.array([1, 0, 2, 1, 3, 2, 0, 3, 5, 4, 6, 5, 7, 6, 4, 7], jnp.int32)
    edge_index = jnp.stack([src, dst], axis=0)                # (2, E)
    batch = jnp.array([0, 0, 0, 0, 1, 1, 1, 1], jnp.int32)    # (N,)

    out = gcn_forward(params, x, edge_index, batch, num_graphs)
    out = jax.block_until_ready(out)
    assert out.shape == (num_graphs, num_classes)
    assert bool(jnp.all(jnp.isfinite(out)))
    print("KERNEL_OK")
</pallas_src>

<mosaic_0001>
module attributes {stable_mosaic.version = 11 : i64} {
  func.func @_gcn_fused_kernel(%arg0: memref<8x128xf32, #tpu.memory_space<vmem>>, %arg1: memref<8x8xf32, #tpu.memory_space<vmem>>, %arg2: memref<128x128xbf16, #tpu.memory_space<vmem>>, %arg3: memref<1x128xf32, #tpu.memory_space<vmem>>, %arg4: memref<1x128xf32, #tpu.memory_space<vmem>>, %arg5: memref<1x128xf32, #tpu.memory_space<vmem>>, %arg6: memref<128x128xbf16, #tpu.memory_space<vmem>>, %arg7: memref<1x128xf32, #tpu.memory_space<vmem>>, %arg8: memref<1x128xf32, #tpu.memory_space<vmem>>, %arg9: memref<1x128xf32, #tpu.memory_space<vmem>>, %arg10: memref<128x128xbf16, #tpu.memory_space<vmem>>, %arg11: memref<1x128xf32, #tpu.memory_space<vmem>>, %arg12: memref<1x128xf32, #tpu.memory_space<vmem>>, %arg13: memref<1x128xf32, #tpu.memory_space<vmem>>, %arg14: memref<8x8xf32, #tpu.memory_space<vmem>>, %arg15: memref<128x1024xbf16, #tpu.memory_space<vmem>>, %arg16: memref<1x1024xf32, #tpu.memory_space<vmem>>, %arg17: memref<1024x128xbf16, #tpu.memory_space<vmem>>, %arg18: memref<1x128xf32, #tpu.memory_space<vmem>>, %arg19: memref<8x128xf32, #tpu.memory_space<vmem>>) attributes {dimension_semantics = [], scalar_prefetch = 0 : i64, scratch_operands = 0 : i64, tpu.core_type = #tpu.core_type<tc>} {
    %c0 = arith.constant 0 : index
    %c0_0 = arith.constant 0 : index
    %0 = vector.load %arg1[%c0, %c0_0] : memref<8x8xf32, #tpu.memory_space<vmem>>, vector<8x8xf32>
    %cst = arith.constant 0.000000e+00 : f32
    %1 = vector.broadcast %cst : f32 to vector<8x8xf32>
    %2 = arith.cmpf ogt, %0, %1 : vector<8x8xf32>
    %c0_1 = arith.constant 0 : index
    %c0_2 = arith.constant 0 : index
    %3 = vector.load %arg0[%c0_1, %c0_2] : memref<8x128xf32, #tpu.memory_space<vmem>>, vector<8x128xf32>
    %c0_3 = arith.constant 0 : index
    %c0_4 = arith.constant 0 : index
    %4 = vector.load %arg2[%c0_3, %c0_4] : memref<128x128xbf16, #tpu.memory_space<vmem>>, vector<128x128xbf16>
    %c0_5 = arith.constant 0 : index
    %c0_6 = arith.constant 0 : index
    %5 = vector.load %arg3[%c0_5, %c0_6] : memref<1x128xf32, #tpu.memory_space<vmem>>, vector<1x128xf32>
    %c0_7 = arith.constant 0 : index
    %c0_8 = arith.constant 0 : index
    %6 = vector.load %arg4[%c0_7, %c0_8] : memref<1x128xf32, #tpu.memory_space<vmem>>, vector<1x128xf32>
    %c0_9 = arith.constant 0 : index
    %c0_10 = arith.constant 0 : index
    %7 = vector.load %arg5[%c0_9, %c0_10] : memref<1x128xf32, #tpu.memory_space<vmem>>, vector<1x128xf32>
    %8 = arith.truncf %3 : vector<8x128xf32> to vector<8x128xbf16>
    %cst_11 = arith.constant dense<0.000000e+00> : vector<8x128xf32>
    %9 = tpu.matmul %8, %4, %cst_11 {dimension_numbers = #tpu.dot_dimension_numbers<[1], [0], [0], [1], [0, 0, 1, 1], [], []>} : vector<8x128xbf16>, vector<128x128xbf16>, vector<8x128xf32> -> vector<8x128xf32>
    %cst_12 = arith.constant dense<0.000000e+00> : vector<8x1xf32>
    %10 = tpu.matmul %9, %6, %cst_12 {dimension_numbers = #tpu.dot_dimension_numbers<[1], [1], [0], [0], [0, 0, 1, 0], [], []>} : vector<8x128xf32>, vector<1x128xf32>, vector<8x1xf32> -> vector<8x1xf32>
    %cst_13 = arith.constant dense<0.000000e+00> : vector<1x8xf32>
    %11 = tpu.matmul %5, %9, %cst_13 {dimension_numbers = #tpu.dot_dimension_numbers<[1], [1], [0], [0], [0, 0, 1, 0], [], []>} : vector<1x128xf32>, vector<8x128xf32>, vector<1x8xf32> -> vector<1x8xf32>
    %12 = vector.broadcast %10 : vector<8x1xf32> to vector<8x8xf32>
    %13 = vector.broadcast %11 : vector<1x8xf32> to vector<8x8xf32>
    %14 = arith.addf %12, %13 : vector<8x8xf32>
    %cst_14 = arith.constant 0.000000e+00 : f32
    %15 = vector.broadcast %cst_14 : f32 to vector<8x8xf32>
    %16 = arith.cmpf ogt, %14, %15 : vector<8x8xf32>
    %cst_15 = arith.constant 2.000000e-01 : f32
    %17 = vector.broadcast %cst_15 : f32 to vector<8x8xf32>
    %18 = arith.mulf %17, %14 : vector<8x8xf32>
    %19 = arith.select %16, %14, %18 : vector<8x8xi1>, vector<8x8xf32>
    %cst_16 = arith.constant -1.000000e+30 : f32
    %20 = vector.broadcast %cst_16 : f32 to vector<8x8xf32>
    %21 = arith.select %2, %19, %20 : vector<8x8xi1>, vector<8x8xf32>
    %cst_17 = arith.constant dense<0xFF800000> : vector<8xf32>
    %22 = vector.multi_reduction <maximumf>, %21, %cst_17 [1] : vector<8x8xf32> to vector<8xf32>
    %23 = vector.shape_cast %22 : vector<8xf32> to vector<8x1xf32>
    %24 = vector.broadcast %23 : vector<8x1xf32> to vector<8x8xf32>
    %25 = arith.subf %21, %24 : vector<8x8xf32>
    %26 = math.exp %25 : vector<8x8xf32>
    %cst_18 = arith.constant 0.000000e+00 : f32
    %27 = vector.broadcast %cst_18 : f32 to vector<8x8xf32>
    %28 = arith.select %2, %26, %27 : vector<8x8xi1>, vector<8x8xf32>
    %cst_19 = arith.constant dense<0.000000e+00> : vector<8xf32>
    %29 = vector.multi_reduction <add>, %28, %cst_19 [1] : vector<8x8xf32> to vector<8xf32>
    %30 = vector.shape_cast %29 : vector<8xf32> to vector<8x1xf32>
    %cst_20 = arith.constant 9.99999968E-21 : f32
    %31 = vector.broadcast %cst_20 : f32 to vector<8x1xf32>
    %32 = arith.maximumf %30, %31 : vector<8x1xf32>
    %33 = tpu.reciprocal %32 {approx = true} : vector<8x1xf32> -> vector<8x1xf32>
    %34 = arith.truncf %28 : vector<8x8xf32> to vector<8x8xbf16>
    %35 = arith.truncf %9 : vector<8x128xf32> to vector<8x128xbf16>
    %cst_21 = arith.constant dense<0.000000e+00> : vector<8x128xf32>
    %36 = tpu.matmul %34, %35, %cst_21 {dimension_numbers = #tpu.dot_dimension_numbers<[1], [0], [0], [1], [0, 0, 1, 1], [], []>} : vector<8x8xbf16>, vector<8x128xbf16>, vector<8x128xf32> -> vector<8x128xf32>
    %37 = vector.broadcast %33 : vector<8x1xf32> to vector<8x128xf32>
    %38 = arith.mulf %36, %37 : vector<8x128xf32>
    %39 = vector.broadcast %7 : vector<1x128xf32> to vector<8x128xf32>
    %40 = arith.addf %38, %39 : vector<8x128xf32>
    %cst_22 = arith.constant 0.000000e+00 : f32
    %41 = vector.broadcast %cst_22 : f32 to vector<8x128xf32>
    %42 = arith.maximumf %40, %41 : vector<8x128xf32>
    %c0_23 = arith.constant 0 : index
    %c0_24 = arith.constant 0 : index
    %43 = vector.load %arg6[%c0_23, %c0_24] : memref<128x128xbf16, #tpu.memory_space<vmem>>, vector<128x128xbf16>
    %c0_25 = arith.constant 0 : index
    %c0_26 = arith.constant 0 : index
    %44 = vector.load %arg7[%c0_25, %c0_26] : memref<1x128xf32, #tpu.memory_space<vmem>>, vector<1x128xf32>
    %c0_27 = arith.constant 0 : index
    %c0_28 = arith.constant 0 : index
    %45 = vector.load %arg8[%c0_27, %c0_28] : memref<1x128xf32, #tpu.memory_space<vmem>>, vector<1x128xf32>
    %c0_29 = arith.constant 0 : index
    %c0_30 = arith.constant 0 : index
    %46 = vector.load %arg9[%c0_29, %c0_30] : memref<1x128xf32, #tpu.memory_space<vmem>>, vector<1x128xf32>
    %47 = arith.truncf %42 : vector<8x128xf32> to vector<8x128xbf16>
    %cst_31 = arith.constant dense<0.000000e+00> : vector<8x128xf32>
    %48 = tpu.matmul %47, %43, %cst_31 {dimension_numbers = #tpu.dot_dimension_numbers<[1], [0], [0], [1], [0, 0, 1, 1], [], []>} : vector<8x128xbf16>, vector<128x128xbf16>, vector<8x128xf32> -> vector<8x128xf32>
    %cst_32 = arith.constant dense<0.000000e+00> : vector<8x1xf32>
    %49 = tpu.matmul %48, %45, %cst_32 {dimension_numbers = #tpu.dot_dimension_numbers<[1], [1], [0], [0], [0, 0, 1, 0], [], []>} : vector<8x128xf32>, vector<1x128xf32>, vector<8x1xf32> -> vector<8x1xf32>
    %cst_33 = arith.constant dense<0.000000e+00> : vector<1x8xf32>
    %50 = tpu.matmul %44, %48, %cst_33 {dimension_numbers = #tpu.dot_dimension_numbers<[1], [1], [0], [0], [0, 0, 1, 0], [], []>} : vector<1x128xf32>, vector<8x128xf32>, vector<1x8xf32> -> vector<1x8xf32>
    %51 = vector.broadcast %49 : vector<8x1xf32> to vector<8x8xf32>
    %52 = vector.broadcast %50 : vector<1x8xf32> to vector<8x8xf32>
    %53 = arith.addf %51, %52 : vector<8x8xf32>
    %cst_34 = arith.constant 0.000000e+00 : f32
    %54 = vector.broadcast %cst_34 : f32 to vector<8x8xf32>
    %55 = arith.cmpf ogt, %53, %54 : vector<8x8xf32>
    %cst_35 = arith.constant 2.000000e-01 : f32
    %56 = vector.broadcast %cst_35 : f32 to vector<8x8xf32>
    %57 = arith.mulf %56, %53 : vector<8x8xf32>
    %58 = arith.select %55, %53, %57 : vector<8x8xi1>, vector<8x8xf32>
    %cst_36 = arith.constant -1.000000e+30 : f32
    %59 = vector.broadcast %cst_36 : f32 to vector<8x8xf32>
    %60 = arith.select %2, %58, %59 : vector<8x8xi1>, vector<8x8xf32>
    %cst_37 = arith.constant dense<0xFF800000> : vector<8xf32>
    %61 = vector.multi_reduction <maximumf>, %60, %cst_37 [1] : vector<8x8xf32> to vector<8xf32>
    %62 = vector.shape_cast %61 : vector<8xf32> to vector<8x1xf32>
    %63 = vector.broadcast %62 : vector<8x1xf32> to vector<8x8xf32>
    %64 = arith.subf %60, %63 : vector<8x8xf32>
    %65 = math.exp %64 : vector<8x8xf32>
    %cst_38 = arith.constant 0.000000e+00 : f32
    %66 = vector.broadcast %cst_38 : f32 to vector<8x8xf32>
    %67 = arith.select %2, %65, %66 : vector<8x8xi1>, vector<8x8xf32>
    %cst_39 = arith.constant dense<0.000000e+00> : vector<8xf32>
    %68 = vector.multi_reduction <add>, %67, %cst_39 [1] : vector<8x8xf32> to vector<8xf32>
    %69 = vector.shape_cast %68 : vector<8xf32> to vector<8x1xf32>
    %cst_40 = arith.constant 9.99999968E-21 : f32
    %70 = vector.broadcast %cst_40 : f32 to vector<8x1xf32>
    %71 = arith.maximumf %69, %70 : vector<8x1xf32>
    %72 = tpu.reciprocal %71 {approx = true} : vector<8x1xf32> -> vector<8x1xf32>
    %73 = arith.truncf %67 : vector<8x8xf32> to vector<8x8xbf16>
    %74 = arith.truncf %48 : vector<8x128xf32> to vector<8x128xbf16>
    %cst_41 = arith.constant dense<0.000000e+00> : vector<8x128xf32>
    %75 = tpu.matmul %73, %74, %cst_41 {dimension_numbers = #tpu.dot_dimension_numbers<[1], [0], [0], [1], [0, 0, 1, 1], [], []>} : vector<8x8xbf16>, vector<8x128xbf16>, vector<8x128xf32> -> vector<8x128xf32>
    %76 = vector.broadcast %72 : vector<8x1xf32> to vector<8x128xf32>
    %77 = arith.mulf %75, %76 : vector<8x128xf32>
    %78 = vector.broadcast %46 : vector<1x128xf32> to vector<8x128xf32>
    %79 = arith.addf %77, %78 : vector<8x128xf32>
    %cst_42 = arith.constant 0.000000e+00 : f32
    %80 = vector.broadcast %cst_42 : f32 to vector<8x128xf32>
    %81 = arith.maximumf %79, %80 : vector<8x128xf32>
    %c0_43 = arith.constant 0 : index
    %c0_44 = arith.constant 0 : index
    %82 = vector.load %arg10[%c0_43, %c0_44] : memref<128x128xbf16, #tpu.memory_space<vmem>>, vector<128x128xbf16>
    %c0_45 = arith.constant 0 : index
    %c0_46 = arith.constant 0 : index
    %83 = vector.load %arg11[%c0_45, %c0_46] : memref<1x128xf32, #tpu.memory_space<vmem>>, vector<1x128xf32>
    %c0_47 = arith.constant 0 : index
    %c0_48 = arith.constant 0 : index
    %84 = vector.load %arg12[%c0_47, %c0_48] : memref<1x128xf32, #tpu.memory_space<vmem>>, vector<1x128xf32>
    %c0_49 = arith.constant 0 : index
    %c0_50 = arith.constant 0 : index
    %85 = vector.load %arg13[%c0_49, %c0_50] : memref<1x128xf32, #tpu.memory_space<vmem>>, vector<1x128xf32>
    %86 = arith.truncf %81 : vector<8x128xf32> to vector<8x128xbf16>
    %cst_51 = arith.constant dense<0.000000e+00> : vector<8x128xf32>
    %87 = tpu.matmul %86, %82, %cst_51 {dimension_numbers = #tpu.dot_dimension_numbers<[1], [0], [0], [1], [0, 0, 1, 1], [], []>} : vector<8x128xbf16>, vector<128x128xbf16>, vector<8x128xf32> -> vector<8x128xf32>
    %cst_52 = arith.constant dense<0.000000e+00> : vector<8x1xf32>
    %88 = tpu.matmul %87, %84, %cst_52 {dimension_numbers = #tpu.dot_dimension_numbers<[1], [1], [0], [0], [0, 0, 1, 0], [], []>} : vector<8x128xf32>, vector<1x128xf32>, vector<8x1xf32> -> vector<8x1xf32>
    %cst_53 = arith.constant dense<0.000000e+00> : vector<1x8xf32>
    %89 = tpu.matmul %83, %87, %cst_53 {dimension_numbers = #tpu.dot_dimension_numbers<[1], [1], [0], [0], [0, 0, 1, 0], [], []>} : vector<1x128xf32>, vector<8x128xf32>, vector<1x8xf32> -> vector<1x8xf32>
    %90 = vector.broadcast %88 : vector<8x1xf32> to vector<8x8xf32>
    %91 = vector.broadcast %89 : vector<1x8xf32> to vector<8x8xf32>
    %92 = arith.addf %90, %91 : vector<8x8xf32>
    %cst_54 = arith.constant 0.000000e+00 : f32
    %93 = vector.broadcast %cst_54 : f32 to vector<8x8xf32>
    %94 = arith.cmpf ogt, %92, %93 : vector<8x8xf32>
    %cst_55 = arith.constant 2.000000e-01 : f32
    %95 = vector.broadcast %cst_55 : f32 to vector<8x8xf32>
    %96 = arith.mulf %95, %92 : vector<8x8xf32>
    %97 = arith.select %94, %92, %96 : vector<8x8xi1>, vector<8x8xf32>
    %cst_56 = arith.constant -1.000000e+30 : f32
    %98 = vector.broadcast %cst_56 : f32 to vector<8x8xf32>
    %99 = arith.select %2, %97, %98 : vector<8x8xi1>, vector<8x8xf32>
    %cst_57 = arith.constant dense<0xFF800000> : vector<8xf32>
    %100 = vector.multi_reduction <maximumf>, %99, %cst_57 [1] : vector<8x8xf32> to vector<8xf32>
    %101 = vector.shape_cast %100 : vector<8xf32> to vector<8x1xf32>
    %102 = vector.broadcast %101 : vector<8x1xf32> to vector<8x8xf32>
    %103 = arith.subf %99, %102 : vector<8x8xf32>
    %104 = math.exp %103 : vector<8x8xf32>
    %cst_58 = arith.constant 0.000000e+00 : f32
    %105 = vector.broadcast %cst_58 : f32 to vector<8x8xf32>
    %106 = arith.select %2, %104, %105 : vector<8x8xi1>, vector<8x8xf32>
    %cst_59 = arith.constant dense<0.000000e+00> : vector<8xf32>
    %107 = vector.multi_reduction <add>, %106, %cst_59 [1] : vector<8x8xf32> to vector<8xf32>
    %108 = vector.shape_cast %107 : vector<8xf32> to vector<8x1xf32>
    %cst_60 = arith.constant 9.99999968E-21 : f32
    %109 = vector.broadcast %cst_60 : f32 to vector<8x1xf32>
    %110 = arith.maximumf %108, %109 : vector<8x1xf32>
    %111 = tpu.reciprocal %110 {approx = true} : vector<8x1xf32> -> vector<8x1xf32>
    %112 = arith.truncf %106 : vector<8x8xf32> to vector<8x8xbf16>
    %113 = arith.truncf %87 : vector<8x128xf32> to vector<8x128xbf16>
    %cst_61 = arith.constant dense<0.000000e+00> : vector<8x128xf32>
    %114 = tpu.matmul %112, %113, %cst_61 {dimension_numbers = #tpu.dot_dimension_numbers<[1], [0], [0], [1], [0, 0, 1, 1], [], []>} : vector<8x8xbf16>, vector<8x128xbf16>, vector<8x128xf32> -> vector<8x128xf32>
    %115 = vector.broadcast %111 : vector<8x1xf32> to vector<8x128xf32>
    %116 = arith.mulf %114, %115 : vector<8x128xf32>
    %117 = vector.broadcast %85 : vector<1x128xf32> to vector<8x128xf32>
    %118 = arith.addf %116, %117 : vector<8x128xf32>
    %cst_62 = arith.constant 0.000000e+00 : f32
    %119 = vector.broadcast %cst_62 : f32 to vector<8x128xf32>
    %120 = arith.maximumf %118, %119 : vector<8x128xf32>
    %c0_63 = arith.constant 0 : index
    %c0_64 = arith.constant 0 : index
    %121 = vector.load %arg14[%c0_63, %c0_64] : memref<8x8xf32, #tpu.memory_space<vmem>>, vector<8x8xf32>
    %122 = arith.truncf %121 : vector<8x8xf32> to vector<8x8xbf16>
    %123 = arith.truncf %120 : vector<8x128xf32> to vector<8x128xbf16>
    %cst_65 = arith.constant dense<0.000000e+00> : vector<8x128xf32>
    %124 = tpu.matmul %122, %123, %cst_65 {dimension_numbers = #tpu.dot_dimension_numbers<[1], [0], [0], [1], [0, 0, 1, 1], [], []>} : vector<8x8xbf16>, vector<8x128xbf16>, vector<8x128xf32> -> vector<8x128xf32>
    %125 = arith.truncf %124 : vector<8x128xf32> to vector<8x128xbf16>
    %c0_66 = arith.constant 0 : index
    %c0_67 = arith.constant 0 : index
    %126 = vector.load %arg15[%c0_66, %c0_67] : memref<128x1024xbf16, #tpu.memory_space<vmem>>, vector<128x1024xbf16>
    %cst_68 = arith.constant dense<0.000000e+00> : vector<8x1024xf32>
    %127 = tpu.matmul %125, %126, %cst_68 {dimension_numbers = #tpu.dot_dimension_numbers<[1], [0], [0], [1], [0, 0, 1, 1], [], []>} : vector<8x128xbf16>, vector<128x1024xbf16>, vector<8x1024xf32> -> vector<8x1024xf32>
    %c0_69 = arith.constant 0 : index
    %c0_70 = arith.constant 0 : index
    %128 = vector.load %arg16[%c0_69, %c0_70] : memref<1x1024xf32, #tpu.memory_space<vmem>>, vector<1x1024xf32>
    %129 = vector.broadcast %128 : vector<1x1024xf32> to vector<8x1024xf32>
    %130 = arith.addf %127, %129 : vector<8x1024xf32>
    %cst_71 = arith.constant 0.000000e+00 : f32
    %131 = vector.broadcast %cst_71 : f32 to vector<8x1024xf32>
    %132 = arith.maximumf %130, %131 : vector<8x1024xf32>
    %133 = arith.truncf %132 : vector<8x1024xf32> to vector<8x1024xbf16>
    %c0_72 = arith.constant 0 : index
    %c0_73 = arith.constant 0 : index
    %134 = vector.load %arg17[%c0_72, %c0_73] : memref<1024x128xbf16, #tpu.memory_space<vmem>>, vector<1024x128xbf16>
    %cst_74 = arith.constant dense<0.000000e+00> : vector<8x128xf32>
    %135 = tpu.matmul %133, %134, %cst_74 {dimension_numbers = #tpu.dot_dimension_numbers<[1], [0], [0], [1], [0, 0, 1, 1], [], []>} : vector<8x1024xbf16>, vector<1024x128xbf16>, vector<8x128xf32> -> vector<8x128xf32>
    %c0_75 = arith.constant 0 : index
    %c0_76 = arith.constant 0 : index
    %136 = vector.load %arg18[%c0_75, %c0_76] : memref<1x128xf32, #tpu.memory_space<vmem>>, vector<1x128xf32>
    %137 = vector.broadcast %136 : vector<1x128xf32> to vector<8x128xf32>
    %138 = arith.addf %135, %137 : vector<8x128xf32>
    %c0_77 = arith.constant 0 : index
    %c0_78 = arith.constant 0 : index
    %139 = vector.load %arg19[%c0_77, %c0_78] : memref<8x128xf32, #tpu.memory_space<vmem>>, vector<8x128xf32>
    tpu.vector_store %arg19[%c0_77, %c0_78], %138 {strides = array<i32>} : memref<8x128xf32, #tpu.memory_space<vmem>>, vector<8x128xf32>,
    return
  }
}

</mosaic_0001>

<bundles_post_ra>
// kernel: gcn_forward.1
= control target key start
LH: loop header
LB: loop body
LE: loop exit
PB: predicated region body
PF: predicated region fallthrough
CT: control target
= control target key end

     0   :  { %v2697_v0 = vmov 0.0   ;;  %vm2698_vm0 = vmmov 0   ;;  %vm280_vm1 = vcmask 1043456   ;;  %v253_v20 = vlaneseq  ;;  %s3413_s2 = inlined_call_operand.vmem [shape: bf16[128,128], index: 2, kind: input, shape index: {}]   ;;  %s3414_s0 = inlined_call_operand.vmem [shape: f32[8,128], index: 0, kind: input, shape index: {}]   ;;  %s3415_s4 = inlined_call_operand.vmem [shape: f32[1,128], index: 4, kind: input, shape index: {}]   ;;  %s3416_s3 = inlined_call_operand.vmem [shape: f32[1,128], index: 3, kind: input, shape index: {}]   ;;  %s3417_s1 = inlined_call_operand.vmem [shape: f32[8,8], index: 1, kind: input, shape index: {}]   ;;  %s3418_s6 = inlined_call_operand.vmem [shape: bf16[128,128], index: 6, kind: input, shape index: {}]   ;;  %s3419_s5 = inlined_call_operand.vmem [shape: f32[1,128], index: 5, kind: input, shape index: {}]   ;;  %s3420_s8 = inlined_call_operand.vmem [shape: f32[1,128], index: 8, kind: input, shape index: {}]   ;;  %s3421_s7 = inlined_call_operand.vmem [shape: f32[1,128], index: 7, kind: input, shape index: {}]   ;;  %s3422_s10 = inlined_call_operand.vmem [shape: bf16[128,128], index: 10, kind: input, shape index: {}]   ;;  %s3423_s9 = inlined_call_operand.vmem [shape: f32[1,128], index: 9, kind: input, shape index: {}]   ;;  %s3424_s12 = inlined_call_operand.vmem [shape: f32[1,128], index: 12, kind: input, shape index: {}]   ;;  %s3425_s11 = inlined_call_operand.vmem [shape: f32[1,128], index: 11, kind: input, shape index: {}]   ;;  %s3426_s15 = inlined_call_operand.vmem [shape: bf16[128,1024], index: 15, kind: input, shape index: {}]   ;;  %s3427_s13 = inlined_call_operand.vmem [shape: f32[1,128], index: 13, kind: input, shape index: {}]   ;;  %s3428_s14 = inlined_call_operand.vmem [shape: f32[8,8], index: 14, kind: input, shape index: {}]   ;;  %s3429_s17 = inlined_call_operand.vmem [shape: bf16[1024,128], index: 17, kind: input, shape index: {}]   ;;  %s3430_s16 = inlined_call_operand.vmem [shape: f32[1,1024], index: 16, kind: input, shape index: {}]   ;;  %s3431_s18 = inlined_call_operand.vmem [shape: f32[1,128], index: 18, kind: input, shape index: {}]   ;;  %s3432_s19 = inlined_call_operand.vmem [shape: f32[8,128], index: 19, kind: output, shape index: {}]  }
   0x1   :  { %3434 = sst [smem:[#allocation2_spill]] %s3413_s2  ;;  %2495 = vmatprep.subr.bf16.mxu0 %v2697_v0  ;;  %2511 = vmatprep.mubr.msk.bf16.mxu0 %vm2698_vm0, %v2697_v0  ;;  %v2863_v27 = vld [vmem:[%s3417_s1] sm:$0xff]  ;;  %vm262_vm4 = vcmask 64512   ;;  %v2605_v40 = vld [vmem:[%s3418_s6 + $0x38] sm:$0xff]   ;;  %v2606_v41 = vld [vmem:[%s3418_s6 + $0x30] sm:$0xff]  }
   0x2   :  { %3435 = sst [smem:[#allocation3_spill]] %s3414_s0  ;;  %2520 = vmatprep.subr.bf16.mxu1 %v2697_v0  ;;  %2522 = vmatprep.mubr.msk.bf16.mxu1 %vm2698_vm0, %v2697_v0  ;;  %v2854_v21 = vshrl.u32 %v253_v20, 7  ;;  %vm64_vm2 = vcmp.gt.f32.partialorder %v2863_v27, 0.0  ;;  %v2607_v42 = vld [vmem:[%s3418_s6 + $0x28] sm:$0xff]   ;;  %v2608_v43 = vld [vmem:[%s3418_s6 + $0x20] sm:$0xff]   ;;  %v2609_v44 = vld [vmem:[%s3418_s6 + $0x18] sm:$0xff]  }
   0x3   :  { %3436 = sst [smem:[#allocation4_spill]] %s3415_s4  ;;  %v2610_v45 = vld [vmem:[%s3418_s6 + $0x10] sm:$0xff]   ;;  %v2611_v46 = vld [vmem:[%s3418_s6 + $0x8] sm:$0xff]   ;;  %v2612_v47 = vld [vmem:[%s3418_s6] sm:$0xff]  }
   0x4   :  { %3437 = sst [smem:[#allocation5_spill]] %s3416_s3  ;;  %v2857_v22 = vsub.s32 0, %v2854_v21  ;;  %v2213_v51 = vld [vmem:[%s3419_s5] ss:$0 sm:$0xff] }
   0x5   :  { %s3438_s20 = sld [smem:[#allocation2_spill]]  ;;  %v2222_v60 = vld [vmem:[%s3420_s8] ss:$0 sm:$0xff] }
   0x6   :  { %s3439_s22 = sld [smem:[#allocation3_spill]] }
   0x7   :  { %s3440_s24 = sld [smem:[#allocation4_spill]] }
   0x8   :  { %s3441_s3 = sld [smem:[#allocation5_spill]] }
   0xb   :  { %v2597_v1 = vld [vmem:[%s3438_s20 + $0x38] sm:$0xff]   ;;  %v2598_v2 = vld [vmem:[%s3438_s20 + $0x30] sm:$0xff]   ;;  %v2599_v3 = vld [vmem:[%s3438_s20 + $0x28] sm:$0xff]  }
   0xc   :  { %2496 = vmatpush3.bf16.msra.mxu0 %v2597_v1  ;;  %v2600_v4 = vld [vmem:[%s3438_s20 + $0x20] sm:$0xff]   ;;  %v2601_v5 = vld [vmem:[%s3438_s20 + $0x18] sm:$0xff]   ;;  %v2602_v6 = vld [vmem:[%s3438_s20 + $0x10] sm:$0xff]  }
   0xd   :  { %2497 = vmatprep.subr.bf16.mxu0 %v2697_v0  ;;  %v2603_v7 = vld [vmem:[%s3438_s20 + $0x8] sm:$0xff]   ;;  %v2604_v8 = vld [vmem:[%s3438_s20] sm:$0xff]  }
   0xe   :  { %v65_v9 = vld [vmem:[%s3439_s22] sm:$0xff] }
   0xf   :  { %v85_v10 = vpack.c.bf16 %v65_v9, %v65_v9  ;;  %v2211_v11 = vld [vmem:[%s3440_s24] ss:$0 sm:$0xff] }
  0x10   :  { %2498 = vmatpush3.bf16.msra.mxu0 %v2598_v2  ;;  %v82_v14 = vld [vmem:[%s3441_s3] sm:$0x1] }
  0x11   :  { %2499 = vmatprep.subr.bf16.mxu0 %v2697_v0  ;;  %v349_v1 = vld [vmem:[%s3421_s7] sm:$0x1] }
  0x14   :  { %2500 = vmatpush3.bf16.msra.mxu0 %v2599_v3 }
  0x15   :  { %2501 = vmatprep.subr.bf16.mxu0 %v2697_v0 }
  0x18   :  { %2502 = vmatpush3.bf16.msra.mxu0 %v2600_v4 }
  0x19   :  { %2503 = vmatprep.subr.bf16.mxu0 %v2697_v0 }
  0x1c   :  { %2504 = vmatpush3.bf16.msra.mxu0 %v2601_v5 }
  0x1d   :  { %2505 = vmatprep.subr.bf16.mxu0 %v2697_v0 }
  0x20   :  { %2506 = vmatpush3.bf16.msra.mxu0 %v2602_v6 }
  0x21   :  { %2507 = vmatprep.subr.bf16.mxu0 %v2697_v0 }
  0x24   :  { %2508 = vmatpush3.bf16.msra.mxu0 %v2603_v7 }
  0x25   :  { %2509 = vmatprep.subr.bf16.mxu0 %v2697_v0 }
  0x28   :  { %2510 = vmatpush3.bf16.msra.mxu0 %v2604_v8 }
  0x29   :  { %2515 = vmatprep.subr.mxu0 %v2697_v0 }
  0x2b   :  { %2512 = vmatmul.mubr.bf16.vlgmr.msra.gmra.mxu0 %v85_v10 }
  0x2c   :  { %2517 = vmatprep.mubr.msk.f32.mxu0 %vm2698_vm0, %v2697_v0 }
  0xeb   :  { %v168_v12 = vpop.f32.mrf.mxu0 }
  0xec   :  { %2516 = vmatpush3.xpose.msra.mxu0 %v168_v12  ;;  %v180_v13 = vmul.f32 %v2211_v11, %v168_v12  ;;  %v276_v15 = vpack.c.bf16 %v168_v12, %v168_v12 }
  0xed   :  { %v2513_v16 = vpop.f32.mrf.mxu0  ;;  %2546 = vmatprep.subr.mxu0 %v2697_v0 }
  0xee   :  { %181 = vadd.xlane.f32.xlu0 %v180_v13  ;;  %v282_v17 = vsel %vm280_vm1, %v276_v15, 0 }
  0xef   :  { %v171_v18 = vpop.f32.mrf.mxu0  ;;  %2518 = vmatmul.mubr.f32.vlgmr.msra.gmra.mxu0 %v82_v14  ;;  %2521 = vmatpush3.bf16.msra.mxu1 %v282_v17 }
  0xf0   :  { %2526 = vmatprep.subr.bf16.mxu1 %v2697_v0  ;;  %2548 = vmatprep.mubr.msk.f32.mxu0 %vm2698_vm0, %v2697_v0 }
  0xf1   :  { %v2514_v19 = vpop.f32.mrf.mxu0 }
 0x177   :  { %v182_v25 = vpop.xlane.xlu0 %181 }
 0x1af   :  { %v249_v23 = vpop.f32.mrf.mxu0 }
 0x1b0   :  { %v256_v24 = vrot.slane %v249_v23, %v2857_v22 }
 0x1b1   :  { %v2519_v26 = vpop.f32.mrf.mxu0 }
 0x1b2   :  { %v257_v28 = vadd.f32 %v256_v24, %v182_v25  ;;  %v2613_v24 = vld [vmem:[%s3422_s10 + $0x38] sm:$0xff]   ;;  %v2614_v25 = vld [vmem:[%s3422_s10 + $0x30] sm:$0xff]   ;;  %v2615_v26 = vld [vmem:[%s3422_s10 + $0x28] sm:$0xff]  }
 0x1b4   :  { %vm258_vm3 = vcmp.gt.f32.partialorder %v257_v28, 0.0  ;;  %v259_v29 = vmul.f32 0.2, %v257_v28 }
 0x1b6   :  { %v260_v30 = vsel %vm258_vm3, %v257_v28, %v259_v29  ;;  %v2616_v28 = vld [vmem:[%s3422_s10 + $0x20] sm:$0xff]   ;;  %v2617_v29 = vld [vmem:[%s3422_s10 + $0x18] sm:$0xff]  }
 0x1b7   :  { %v261_v31 = vsel %vm64_vm2, %v260_v30, -1e+30  ;;  %v2618_v30 = vld [vmem:[%s3422_s10 + $0x10] sm:$0xff]  }
 0x1b8   :  { %v263_v32 = vsel %vm262_vm4, %v261_v31, -inf }
 0x1b9   :  { %264 = vmax.xlane.f32.xlu0 %v263_v32  ;;  %v2620_v32 = vld [vmem:[%s3422_s10] sm:$0xff]  }
 0x242   :  { %v265_v33 = vpop.xlane.xlu0 %264 }
 0x243   :  { %v266_v34 = vsub.f32 %v261_v31, %v265_v33  ;;  %v2619_v31 = vld [vmem:[%s3422_s10 + $0x8] sm:$0xff]  }
 0x245   :  { %v267_v35 = vmul.f32 1.442695, %v266_v34 }
 0x247   :  { %2685 = vpow2.f32 %v267_v35 }
 0x254   :  { %v2686_v36 = vpop.eup %2685 }
 0x255   :  { %v269_v37 = vsel %vm64_vm2, %v2686_v36, 0.0  ;;  %v2224_v36 = vld [vmem:[%s3423_s9] ss:$0 sm:$0xff] }
 0x256   :  { %v270_v38 = vsel %vm262_vm4, %v269_v37, 0.0  ;;  %v275_v39 = vpack.c.bf16 %v269_v37, %v269_v37 }
 0x257   :  { %271 = vadd.xlane.f32.xlu1 %v270_v38 }
 0x258   :  { %2523 = vmatmul.mubr.msk.bf16.vlgmr.msra.gmra.mxu1 %vm262_vm4, %v275_v39 }
 0x259   :  { %2542 = vmatprep.mubr.msk.bf16.mxu1 %vm2698_vm0, %v2697_v0  ;;  %2527 = vmatpush3.bf16.msra.mxu1 %v2605_v40 }
 0x25a   :  { %2528 = vmatprep.subr.bf16.mxu1 %v2697_v0 }
 0x25d   :  { %2529 = vmatpush3.bf16.msra.mxu1 %v2606_v41 }
 0x25e   :  { %2530 = vmatprep.subr.bf16.mxu1 %v2697_v0 }
 0x261   :  { %2531 = vmatpush3.bf16.msra.mxu1 %v2607_v42 }
 0x262   :  { %2532 = vmatprep.subr.bf16.mxu1 %v2697_v0 }
 0x265   :  { %2533 = vmatpush3.bf16.msra.mxu1 %v2608_v43 }
 0x266   :  { %2534 = vmatprep.subr.bf16.mxu1 %v2697_v0 }
 0x269   :  { %2535 = vmatpush3.bf16.msra.mxu1 %v2609_v44 }
 0x26a   :  { %2536 = vmatprep.subr.bf16.mxu1 %v2697_v0 }
 0x26d   :  { %2537 = vmatpush3.bf16.msra.mxu1 %v2610_v45  ;;  %v2233_v45 = vld [vmem:[%s3424_s12] ss:$0 sm:$0xff] }
 0x26e   :  { %2538 = vmatprep.subr.bf16.mxu1 %v2697_v0 }
 0x271   :  { %2539 = vmatpush3.bf16.msra.mxu1 %v2611_v46 }
 0x272   :  { %2540 = vmatprep.subr.bf16.mxu1 %v2697_v0 }
 0x275   :  { %2541 = vmatpush3.bf16.msra.mxu1 %v2612_v47 }
 0x276   :  { %2557 = vmatprep.subr.bf16.mxu1 %v2697_v0 }
 0x2e0   :  { %v272_v48 = vpop.xlane.xlu1 %271 }
 0x2e1   :  { %v273_v49 = vmax.f32 %v272_v48, 1e-20 }
 0x2e3   :  { %2687 = vrcp.f32 %v273_v49  ;;  %v614_v49 = vld [vmem:[%s3425_s11] sm:$0x1] }
 0x2f0   :  { %v2688_v50 = vpop.eup %2687 }
 0x318   :  { %v318_v52 = vpop.f32.mrf.mxu1 }
 0x319   :  { %v324_v53 = vmul.f32 %v2688_v50, %v318_v52 }
 0x31a   :  { %v2524_v54 = vpop.f32.mrf.mxu1 }
 0x31b   :  { %v331_v55 = vadd.f32 %v2213_v51, %v324_v53 }
 0x31c   :  { %v321_v56 = vpop.f32.mrf.mxu1 }
 0x31d   :  { %v332_v57 = vmax.f32 %v331_v55, 0.0 }
 0x31e   :  { %v2525_v58 = vpop.f32.mrf.mxu1 }
 0x31f   :  { %v352_v59 = vpack.c.bf16 %v332_v57, %v332_v57 }
 0x321   :  { %2543 = vmatmul.mubr.bf16.vlgmr.msra.gmra.mxu1 %v352_v59 }
 0x322   :  { %2573 = vmatprep.mubr.msk.bf16.mxu1 %vm2698_vm0, %v2697_v0  ;;  %2558 = vmatpush3.bf16.msra.mxu1 %v2613_v24  ;;  %v942_v24 = vld [vmem:[%s3426_s15 + $0xe8] sm:$0xff] }
 0x323   :  { %2559 = vmatprep.subr.bf16.mxu1 %v2697_v0 }
 0x326   :  { %2560 = vmatpush3.bf16.msra.mxu1 %v2614_v25 }
 0x327   :  { %2561 = vmatprep.subr.bf16.mxu1 %v2697_v0 }
 0x32a   :  { %2562 = vmatpush3.bf16.msra.mxu1 %v2615_v26 }
 0x32b   :  { %2563 = vmatprep.subr.bf16.mxu1 %v2697_v0 }
 0x32e   :  { %2564 = vmatpush3.bf16.msra.mxu1 %v2616_v28  ;;  %v930_v28 = vld [vmem:[%s3426_s15 + $0x88] sm:$0xff] }
 0x32f   :  { %2565 = vmatprep.subr.bf16.mxu1 %v2697_v0 }
 0x332   :  { %2566 = vmatpush3.bf16.msra.mxu1 %v2617_v29  ;;  %v934_v29 = vld [vmem:[%s3426_s15 + $0xa8] sm:$0xff] }
 0x333   :  { %2567 = vmatprep.subr.bf16.mxu1 %v2697_v0 }
 0x336   :  { %2568 = vmatpush3.bf16.msra.mxu1 %v2618_v30  ;;  %v2256_v30 = vcombine.high %v930_v28, %v934_v29 }
 0x337   :  { %2569 = vmatprep.subr.bf16.mxu1 %v2697_v0 }
 0x33a   :  { %2570 = vmatpush3.bf16.msra.mxu1 %v2619_v31  ;;  %v2255_v31 = vcombine.low %v930_v28, %v934_v29  ;;  %v976_v29 = vld [vmem:[%s3426_s15 + $0x1f8] sm:$0xff] }
 0x33b   :  { %2571 = vmatprep.subr.bf16.mxu1 %v2697_v0 }
 0x33e   :  { %2572 = vmatpush3.bf16.msra.mxu1 %v2620_v32  ;;  %v922_v32 = vld [vmem:[%s3426_s15 + $0x48] sm:$0xff] }
 0x3e1   :  { %v435_v61 = vpop.f32.mrf.mxu1 }
 0x3e2   :  { %v542_v62 = vpack.c.bf16 %v435_v61, %v435_v61  ;;  %2547 = vmatpush3.xpose.msra.mxu0 %v435_v61  ;;  %v447_v63 = vmul.f32 %v2222_v60, %v435_v61 }
 0x3e3   :  { %v2544_v2 = vpop.f32.mrf.mxu1  ;;  %2551 = vmatprep.subr.bf16.mxu0 %v2697_v0 }
 0x3e4   :  { %448 = vadd.xlane.f32.xlu1 %v447_v63  ;;  %v547_v3 = vsel %vm280_vm1, %v542_v62, 0 }
 0x3e5   :  { %v438_v4 = vpop.f32.mrf.mxu1  ;;  %2549 = vmatmul.mubr.f32.vlgmr.msra.gmra.mxu0 %v349_v1 }
 0x3e6   :  { %2552 = vmatpush3.bf16.msra.mxu0 %v547_v3  ;;  %2553 = vmatprep.mubr.msk.bf16.mxu0 %vm2698_vm0, %v2697_v0 }
 0x3e7   :  { %v2545_v5 = vpop.f32.mrf.mxu1  ;;  %2577 = vmatprep.subr.mxu0 %v2697_v0 }
 0x46d   :  { %v449_v8 = vpop.xlane.xlu1 %448 }
 0x4a5   :  { %v516_v6 = vpop.f32.mrf.mxu0 }
 0x4a6   :  { %v523_v7 = vrot.slane %v516_v6, %v2857_v22 }
 0x4a7   :  { %v2550_v9 = vpop.f32.mrf.mxu0 }
 0x4a8   :  { %v524_v10 = vadd.f32 %v523_v7, %v449_v8  ;;  %v970_v7 = vld [vmem:[%s3426_s15 + $0x1c8] sm:$0xff] }
 0x4a9   :  { %v974_v8 = vld [vmem:[%s3426_s15 + $0x1e8] sm:$0xff] }
 0x4aa   :  { %vm525_vm5 = vcmp.gt.f32.partialorder %v524_v10, 0.0  ;;  %v526_v11 = vmul.f32 0.2, %v524_v10  ;;  %v2295_v9 = vcombine.low %v970_v7, %v974_v8  ;;  %v2296_v27 = vcombine.high %v970_v7, %v974_v8  ;;  %v937_v7 = vld [vmem:[%s3426_s15 + $0xc0] sm:$0xff] }
 0x4ab   :  { %v941_v8 = vld [vmem:[%s3426_s15 + $0xe0] sm:$0xff] }
 0x4ac   :  { %v527_v12 = vsel %vm525_vm5, %v524_v10, %v526_v11  ;;  %v962_v10 = vld [vmem:[%s3426_s15 + $0x188] sm:$0xff]  ;;  %1380 = vmatprep.subr.bf16.mxu1 %v2296_v27  ;;  %v2262_v27 = vcombine.high %v937_v7, %v941_v8 }
 0x4ad   :  { %v528_v13 = vsel %vm64_vm2, %v527_v12, -1e+30  ;;  %v966_v11 = vld [vmem:[%s3426_s15 + $0x1a8] sm:$0xff] }
 0x4ae   :  { %v529_v14 = vsel %vm262_vm4, %v528_v13, -inf  ;;  %v2288_v12 = vcombine.high %v962_v10, %v966_v11 }
 0x4af   :  { %530 = vmax.xlane.f32.xlu0 %v529_v14  ;;  %v958_v14 = vld [vmem:[%s3426_s15 + $0x168] sm:$0xff] }
 0x538   :  { %v531_v15 = vpop.xlane.xlu0 %530 }
 0x539   :  { %v532_v16 = vsub.f32 %v528_v13, %v531_v15  ;;  %v954_v13 = vld [vmem:[%s3426_s15 + $0x148] sm:$0xff] }
 0x53a   :  { %v2280_v15 = vcombine.high %v954_v13, %v958_v14 }
 0x53b   :  { %v533_v17 = vmul.f32 1.442695, %v532_v16  ;;  %v2279_v16 = vcombine.low %v954_v13, %v958_v14  ;;  %v921_v13 = vld [vmem:[%s3426_s15 + $0x40] sm:$0xff] }
 0x53c   :  { %v925_v14 = vld [vmem:[%s3426_s15 + $0x60] sm:$0xff] }
 0x53d   :  { %2689 = vpow2.f32 %v533_v17  ;;  %v946_v17 = vld [vmem:[%s3426_s15 + $0x108] sm:$0xff] }
 0x54a   :  { %v2690_v18 = vpop.eup %2689 }
 0x54b   :  { %v535_v19 = vsel %vm64_vm2, %v2690_v18, 0.0  ;;  %v950_v18 = vld [vmem:[%s3426_s15 + $0x128] sm:$0xff] }
 0x54c   :  { %v536_v20 = vsel %vm262_vm4, %v535_v19, 0.0  ;;  %v541_v23 = vpack.c.bf16 %v535_v19, %v535_v19  ;;  %v2272_v19 = vcombine.high %v946_v17, %v950_v18 }
 0x54d   :  { %537 = vadd.xlane.f32.xlu1 %v536_v20  ;;  %v2271_v20 = vcombine.low %v946_v17, %v950_v18  ;;  %v913_v17 = vld [vmem:[%s3426_s15] sm:$0xff] }
 0x54e   :  { %2554 = vmatmul.mubr.msk.bf16.vlgmr.msra.gmra.mxu0 %vm262_vm4, %v541_v23  ;;  %v938_v23 = vld [vmem:[%s3426_s15 + $0xc8] sm:$0xff]  ;;  %v917_v18 = vld [vmem:[%s3426_s15 + $0x20] sm:$0xff] }
 0x54f   :  { %2579 = vmatprep.mubr.msk.f32.mxu0 %vm2698_vm0, %v2697_v0  ;;  %v2264_v25 = vcombine.high %v938_v23, %v942_v24  ;;  %v2263_v26 = vcombine.low %v938_v23, %v942_v24  ;;  %v2237_v23 = vcombine.low %v913_v17, %v917_v18  ;;  %v971_v24 = vld [vmem:[%s3426_s15 + $0x1d0] sm:$0xff] }
 0x5d6   :  { %v538_v33 = vpop.xlane.xlu1 %537 }
 0x5d7   :  { %v539_v34 = vmax.f32 %v538_v33, 1e-20  ;;  %v926_v33 = vld [vmem:[%s3426_s15 + $0x68] sm:$0xff] }
 0x5d9   :  { %2691 = vrcp.f32 %v539_v34  ;;  %v2248_v34 = vcombine.high %v922_v32, %v926_v33 }
 0x5e6   :  { %v2692_v35 = vpop.eup %2691 }
 0x60e   :  { %v583_v37 = vpop.f32.mrf.mxu0 }
 0x60f   :  { %v589_v38 = vmul.f32 %v2692_v35, %v583_v37  ;;  %v2247_v35 = vcombine.low %v922_v32, %v926_v33  ;;  %v918_v37 = vld [vmem:[%s3426_s15 + $0x28] sm:$0xff]  ;;  %v2699_v33 = vmov 0  }
 0x610   :  { %v2555_v39 = vpop.f32.mrf.mxu0 }
 0x611   :  { %v596_v40 = vadd.f32 %v2224_v36, %v589_v38  ;;  %v914_v36 = vld [vmem:[%s3426_s15 + $0x8] sm:$0xff] }
 0x612   :  { %v586_v41 = vpop.f32.mrf.mxu0  ;;  %v2240_v38 = vcombine.high %v914_v36, %v918_v37  ;;  %v2239_v39 = vcombine.low %v914_v36, %v918_v37  ;;  %v964_v36 = vld [vmem:[%s3426_s15 + $0x198] sm:$0xff] }
 0x613   :  { %v597_v42 = vmax.f32 %v596_v40, 0.0  ;;  %v968_v37 = vld [vmem:[%s3426_s15 + $0x1b8] sm:$0xff] }
 0x614   :  { %v2556_v43 = vpop.f32.mrf.mxu0 }
 0x615   :  { %v617_v44 = vpack.c.bf16 %v597_v42, %v597_v42  ;;  %v2235_v43 = vld [vmem:[%s3427_s13] ss:$0 sm:$0xff] }
 0x617   :  { %2574 = vmatmul.mubr.bf16.vlgmr.msra.gmra.mxu1 %v617_v44 }
 0x618   :  { %1381 = vmatpush1.bf16.msra.mxu1 %v2295_v9  ;;  %1412 = vmatprep.mubr.bf16.mxu1 %v2699_v33 }
 0x619   :  { %1382 = vmatprep.subr.bf16.mxu1 %v2288_v12  ;;  %v2261_v12 = vcombine.low %v937_v7, %v941_v8  ;;  %v935_v7 = vld [vmem:[%s3426_s15 + $0xb0] sm:$0xff]  ;;  %v932_v8 = vld [vmem:[%s3426_s15 + $0x98] sm:$0xff] }
 0x6d7   :  { %v700_v46 = vpop.f32.mrf.mxu1 }
 0x6d8   :  { %v807_v47 = vpack.c.bf16 %v700_v46, %v700_v46  ;;  %2578 = vmatpush3.xpose.msra.mxu0 %v700_v46  ;;  %v712_v48 = vmul.f32 %v2233_v45, %v700_v46 }
 0x6d9   :  { %v2575_v50 = vpop.f32.mrf.mxu1  ;;  %2582 = vmatprep.subr.bf16.mxu0 %v2697_v0 }
 0x6da   :  { %713 = vadd.xlane.f32.xlu0 %v712_v48  ;;  %v812_v51 = vsel %vm280_vm1, %v807_v47, 0  ;;  %v973_v50 = vld [vmem:[%s3426_s15 + $0x1e0] sm:$0xff] }
 0x6db   :  { %v703_v52 = vpop.f32.mrf.mxu1  ;;  %2580 = vmatmul.mubr.f32.vlgmr.msra.gmra.mxu0 %v614_v49  ;;  %v969_v49 = vld [vmem:[%s3426_s15 + $0x1c0] sm:$0xff] }
 0x6dc   :  { %2583 = vmatpush3.bf16.msra.mxu0 %v812_v51  ;;  %2584 = vmatprep.mubr.msk.bf16.mxu0 %vm2698_vm0, %v2697_v0 }
 0x6dd   :  { %v2576_v53 = vpop.f32.mrf.mxu1  ;;  %2588 = vmatprep.subr.bf16.mxu0 %v2697_v0 }
 0x6de   :  { %v863_v53 = vld [vmem:[%s3428_s14] sm:$0xff] }
 0x763   :  { %v714_v56 = vpop.xlane.xlu0 %713 }
 0x79b   :  { %v781_v54 = vpop.f32.mrf.mxu0 }
 0x79c   :  { %v788_v55 = vrot.slane %v781_v54, %v2857_v22 }
 0x79d   :  { %v2581_v57 = vpop.f32.mrf.mxu0 }
 0x79e   :  { %v789_v58 = vadd.f32 %v788_v55, %v714_v56  ;;  %v2294_v55 = vcombine.high %v969_v49, %v973_v50  ;;  %v961_v56 = vld [vmem:[%s3426_s15 + $0x180] sm:$0xff] }
 0x79f   :  { %v965_v57 = vld [vmem:[%s3426_s15 + $0x1a0] sm:$0xff] }
 0x7a0   :  { %vm790_vm6 = vcmp.gt.f32.partialorder %v789_v58, 0.0  ;;  %v791_v59 = vmul.f32 0.2, %v789_v58 }
 0x7a2   :  { %v792_v60 = vsel %vm790_vm6, %v789_v58, %v791_v59  ;;  %v864_v59 = vpack.c.bf16 %v863_v53, %v863_v53 }
 0x7a3   :  { %v793_v61 = vsel %vm64_vm2, %v792_v60, -1e+30  ;;  %v2293_v60 = vcombine.low %v969_v49, %v973_v50  ;;  %v2291_v49 = vcombine.low %v964_v36, %v968_v37 }
 0x7a4   :  { %v794_v62 = vsel %vm262_vm4, %v793_v61, -inf }
 0x7a5   :  { %795 = vmax.xlane.f32.xlu1 %v794_v62  ;;  %v953_v62 = vld [vmem:[%s3426_s15 + $0x140] sm:$0xff] }
 0x82e   :  { %v796_v63 = vpop.xlane.xlu1 %795 }
 0x82f   :  { %v797_v1 = vsub.f32 %v793_v61, %v796_v63  ;;  %v2286_v61 = vcombine.high %v961_v56, %v965_v57  ;;  %v957_v63 = vld [vmem:[%s3426_s15 + $0x160] sm:$0xff] }
 0x831   :  { %v798_v2 = vmul.f32 1.442695, %v797_v1  ;;  %v2285_v1 = vcombine.low %v961_v56, %v965_v57  ;;  %v952_v56 = vld [vmem:[%s3426_s15 + $0x138] sm:$0xff] }
 0x833   :  { %2693 = vpow2.f32 %v798_v2  ;;  %v2278_v2 = vcombine.high %v953_v62, %v957_v63 }
 0x840   :  { %v2694_v3 = vpop.eup %2693 }
 0x841   :  { %v800_v4 = vsel %vm64_vm2, %v2694_v3, 0.0  ;;  %v945_v3 = vld [vmem:[%s3426_s15 + $0x100] sm:$0xff] }
 0x842   :  { %v801_v5 = vsel %vm262_vm4, %v800_v4, 0.0  ;;  %v806_v6 = vpack.c.bf16 %v800_v4, %v800_v4  ;;  %v949_v4 = vld [vmem:[%s3426_s15 + $0x120] sm:$0xff] }
 0x843   :  { %802 = vadd.xlane.f32.xlu0 %v801_v5  ;;  %v2277_v5 = vcombine.low %v953_v62, %v957_v63  ;;  %v2269_v9 = vcombine.low %v945_v3, %v949_v4  ;;  %v943_v62 = vld [vmem:[%s3426_s15 + $0xf0] sm:$0xff]  ;;  %v940_v63 = vld [vmem:[%s3426_s15 + $0xd8] sm:$0xff] }
 0x844   :  { %2585 = vmatmul.mubr.msk.bf16.vlgmr.msra.gmra.mxu0 %vm262_vm4, %v806_v6  ;;  %v2270_v6 = vcombine.high %v945_v3, %v949_v4 }
 0x845   :  { %2590 = vmatprep.mubr.msk.bf16.mxu0 %vm2698_vm0, %v2697_v0  ;;  %v2287_v0 = vcombine.low %v962_v10, %v966_v11  ;;  %v929_v10 = vld [vmem:[%s3426_s15 + $0x80] sm:$0xff] }
 0x846   :  { %v933_v11 = vld [vmem:[%s3426_s15 + $0xa0] sm:$0xff] }
 0x847   :  { %1383 = vmatpush1.bf16.msra.mxu1 %v2287_v0  ;;  %v2254_v0 = vcombine.high %v929_v10, %v933_v11 }
 0x848   :  { %1384 = vmatprep.subr.bf16.mxu1 %v2280_v15  ;;  %v2253_v15 = vcombine.low %v929_v10, %v933_v11 }
 0x84b   :  { %1385 = vmatpush1.bf16.msra.mxu1 %v2279_v16  ;;  %v2246_v16 = vcombine.high %v921_v13, %v925_v14 }
 0x84c   :  { %1386 = vmatprep.subr.bf16.mxu1 %v2272_v19  ;;  %v2245_v19 = vcombine.low %v921_v13, %v925_v14  ;;  %v927_v13 = vld [vmem:[%s3426_s15 + $0x70] sm:$0xff]  ;;  %v924_v14 = vld [vmem:[%s3426_s15 + $0x58] sm:$0xff] }
 0x84f   :  { %1387 = vmatpush1.bf16.msra.mxu1 %v2271_v20  ;;  %v2238_v20 = vcombine.high %v913_v17, %v917_v18 }
 0x850   :  { %1388 = vmatprep.subr.bf16.mxu1 %v2264_v25  ;;  %v975_v25 = vld [vmem:[%s3426_s15 + $0x1f0] sm:$0xff] }
 0x851   :  { %v2298_v28 = vcombine.high %v971_v24, %v975_v25 }
 0x853   :  { %1389 = vmatpush1.bf16.msra.mxu1 %v2263_v26  ;;  %v972_v26 = vld [vmem:[%s3426_s15 + $0x1d8] sm:$0xff] }
 0x854   :  { %1390 = vmatprep.subr.bf16.mxu1 %v2256_v30  ;;  %v2297_v30 = vcombine.low %v971_v24, %v975_v25  ;;  %v2300_v32 = vcombine.high %v972_v26, %v976_v29  ;;  %v916_v24 = vld [vmem:[%s3426_s15 + $0x18] sm:$0xff] }
 0x855   :  { %v920_v25 = vld [vmem:[%s3426_s15 + $0x38] sm:$0xff] }
 0x857   :  { %1391 = vmatpush1.bf16.msra.mxu1 %v2255_v31  ;;  %v2299_v31 = vcombine.low %v972_v26, %v976_v29 }
 0x858   :  { %1392 = vmatprep.subr.bf16.mxu1 %v2248_v34  ;;  %v963_v34 = vld [vmem:[%s3426_s15 + $0x190] sm:$0xff] }
 0x85b   :  { %1393 = vmatpush1.bf16.msra.mxu1 %v2247_v35  ;;  %v967_v35 = vld [vmem:[%s3426_s15 + $0x1b0] sm:$0xff] }
 0x85c   :  { %1394 = vmatprep.subr.bf16.mxu1 %v2240_v38 }
 0x85f   :  { %1395 = vmatpush1.bf16.msra.mxu1 %v2239_v39 }
 0x860   :  { %1462 = vmatprep.subr.bf16.mxu1 %v2300_v32  ;;  %v2243_v32 = vcombine.low %v916_v24, %v920_v25 }
 0x8cc   :  { %v803_v40 = vpop.xlane.xlu0 %802 }
 0x8cd   :  { %v804_v41 = vmax.f32 %v803_v40, 1e-20  ;;  %v2290_v40 = vcombine.high %v963_v34, %v967_v35 }
 0x8cf   :  { %2695 = vrcp.f32 %v804_v41  ;;  %v2292_v41 = vcombine.high %v964_v36, %v968_v37  ;;  %v2624_v36 = vld [vmem:[%s3429_s17 + $0xb8] sm:$0xff]   ;;  %v2625_v37 = vld [vmem:[%s3429_s17 + $0x70] sm:$0xff]  }
 0x8dc   :  { %v2696_v42 = vpop.eup %2695 }
 0x904   :  { %v848_v44 = vpop.f32.mrf.mxu0 }
 0x905   :  { %v854_v45 = vmul.f32 %v2696_v42, %v848_v44  ;;  %v955_v42 = vld [vmem:[%s3426_s15 + $0x150] sm:$0xff] }
 0x906   :  { %v2586_v46 = vpop.f32.mrf.mxu0  ;;  %v959_v44 = vld [vmem:[%s3426_s15 + $0x170] sm:$0xff] }
 0x907   :  { %v861_v47 = vadd.f32 %v2235_v43, %v854_v45  ;;  %v956_v45 = vld [vmem:[%s3426_s15 + $0x158] sm:$0xff]  ;;  %v2282_v50 = vcombine.high %v955_v42, %v959_v44  ;;  %v2281_v57 = vcombine.low %v955_v42, %v959_v44  ;;  %v2629_v42 = vld [vmem:[%s3429_s17 + $0x68] sm:$0xff]  }
 0x908   :  { %v851_v48 = vpop.f32.mrf.mxu0  ;;  %v960_v46 = vld [vmem:[%s3426_s15 + $0x178] sm:$0xff]  ;;  %v2632_v44 = vld [vmem:[%s3429_s17 + $0xa8] sm:$0xff]  }
 0x909   :  { %v862_v51 = vmax.f32 %v861_v47, 0.0  ;;  %v2289_v48 = vcombine.low %v963_v34, %v967_v35  ;;  %v2622_v34 = vld [vmem:[%s3429_s17 + $0xf8] sm:$0xff]  }
 0x90a   :  { %v2587_v52 = vpop.f32.mrf.mxu0  ;;  %v2623_v35 = vld [vmem:[%s3429_s17 + $0x38] sm:$0xff]  }
 0x90b   :  { %v865_v54 = vpack.c.bf16 %v862_v51, %v862_v51  ;;  %v2284_v51 = vcombine.high %v956_v45, %v960_v46  ;;  %v947_v52 = vld [vmem:[%s3426_s15 + $0x110] sm:$0xff] }
 0x90d   :  { %v870_v58 = vsel %vm280_vm1, %v865_v54, 0  ;;  %v951_v54 = vld [vmem:[%s3426_s15 + $0x130] sm:$0xff] }
 0x90e   :  { %2589 = vmatpush3.bf16.msra.mxu0 %v870_v58  ;;  %v2283_v58 = vcombine.low %v956_v45, %v960_v46  ;;  %v2633_v45 = vld [vmem:[%s3429_s17 + $0x60] sm:$0xff]  }
 0x90f   :  { %1339 = vmatprep.subr.bf16.mxu0 %v2294_v55  ;;  %v948_v55 = vld [vmem:[%s3426_s15 + $0x118] sm:$0xff]  ;;  %v2634_v46 = vld [vmem:[%s3429_s17 + $0xe0] sm:$0xff]  }
 0x910   :  { %v2275_v3 = vcombine.low %v948_v55, %v952_v56 }
 0x911   :  { %2591 = vmatmul.mubr.msk.bf16.vlgmr.msra.gmra.mxu0 %vm262_vm4, %v864_v59  ;;  %v2274_v59 = vcombine.high %v947_v52, %v951_v54 }
 0x912   :  { %1340 = vmatpush1.bf16.msra.mxu0 %v2293_v60  ;;  %1371 = vmatprep.mubr.bf16.mxu0 %v2699_v33  ;;  %v2276_v60 = vcombine.high %v948_v55, %v952_v56  ;;  %v2643_v55 = vld [vmem:[%s3429_s17 + $0x10] sm:$0xff]  }
 0x913   :  { %1341 = vmatprep.subr.bf16.mxu0 %v2286_v61  ;;  %v939_v61 = vld [vmem:[%s3426_s15 + $0xd0] sm:$0xff] }
 0x914   :  { %v2266_v4 = vcombine.high %v939_v61, %v943_v62  ;;  %v2644_v56 = vld [vmem:[%s3429_s17 + $0x90] sm:$0xff]  }
 0x916   :  { %1342 = vmatpush1.bf16.msra.mxu0 %v2285_v1  ;;  %v944_v1 = vld [vmem:[%s3426_s15 + $0xf8] sm:$0xff] }
 0x917   :  { %1343 = vmatprep.subr.bf16.mxu0 %v2278_v2  ;;  %v2273_v2 = vcombine.low %v947_v52, %v951_v54  ;;  %v2267_v10 = vcombine.low %v940_v63, %v944_v1  ;;  %v2640_v52 = vld [vmem:[%s3429_s17 + $0x98] sm:$0xff]   ;;  %v2642_v54 = vld [vmem:[%s3429_s17 + $0xd0] sm:$0xff]  }
 0x91a   :  { %1344 = vmatpush1.bf16.msra.mxu0 %v2277_v5  ;;  %v2268_v5 = vcombine.high %v940_v63, %v944_v1  ;;  %v2651_v63 = vld [vmem:[%s3429_s17] sm:$0xff]  }
 0x91b   :  { %1345 = vmatprep.subr.bf16.mxu0 %v2270_v6  ;;  %v931_v6 = vld [vmem:[%s3426_s15 + $0x90] sm:$0xff]  ;;  %v2652_v1 = vld [vmem:[%s3429_s17 + $0x80] sm:$0xff]  }
 0x91c   :  { %v2258_v11 = vcombine.high %v931_v6, %v935_v7 }
 0x91e   :  { %1346 = vmatpush1.bf16.msra.mxu0 %v2269_v9  ;;  %v936_v9 = vld [vmem:[%s3426_s15 + $0xb8] sm:$0xff] }
 0x91f   :  { %1347 = vmatprep.subr.bf16.mxu0 %v2262_v27  ;;  %v2265_v27 = vcombine.low %v939_v61, %v943_v62  ;;  %v2259_v17 = vcombine.low %v932_v8, %v936_v9  ;;  %v2649_v61 = vld [vmem:[%s3429_s17 + $0x40] sm:$0xff]  }
 0x920   :  { %v2650_v62 = vld [vmem:[%s3429_s17 + $0xc0] sm:$0xff]  }
 0x922   :  { %1348 = vmatpush1.bf16.msra.mxu0 %v2261_v12  ;;  %v2260_v12 = vcombine.high %v932_v8, %v936_v9 }
 0x923   :  { %1349 = vmatprep.subr.bf16.mxu0 %v2254_v0  ;;  %v923_v0 = vld [vmem:[%s3426_s15 + $0x50] sm:$0xff] }
 0x924   :  { %v2250_v18 = vcombine.high %v923_v0, %v927_v13  ;;  %v2249_v26 = vcombine.low %v923_v0, %v927_v13 }
 0x926   :  { %1350 = vmatpush1.bf16.msra.mxu0 %v2253_v15  ;;  %v928_v15 = vld [vmem:[%s3426_s15 + $0x78] sm:$0xff] }
 0x927   :  { %1351 = vmatprep.subr.bf16.mxu0 %v2246_v16  ;;  %v2257_v16 = vcombine.low %v931_v6, %v935_v7  ;;  %v985_v6 = vsub.s32 1, %v2854_v21  ;;  %v993_v7 = vsub.s32 3, %v2854_v21 }
 0x92a   :  { %1352 = vmatpush1.bf16.msra.mxu0 %v2245_v19  ;;  %v2252_v19 = vcombine.high %v924_v14, %v928_v15 }
 0x92b   :  { %1353 = vmatprep.subr.bf16.mxu0 %v2238_v20  ;;  %v915_v20 = vld [vmem:[%s3426_s15 + $0x10] sm:$0xff] }
 0x92e   :  { %1354 = vmatpush1.bf16.msra.mxu0 %v2237_v23  ;;  %v919_v23 = vld [vmem:[%s3426_s15 + $0x30] sm:$0xff] }
 0x92f   :  { %1421 = vmatprep.subr.bf16.mxu0 %v2298_v28  ;;  %v2251_v28 = vcombine.low %v924_v14, %v928_v15  ;;  %v2242_v29 = vcombine.high %v915_v20, %v919_v23 }
 0x9d1   :  { %v906_v38 = vpop.f32.mrf.mxu0 }
 0x9d2   :  { %v3116_v39 = vpack.c.bf16 %v906_v38, %v906_v38  ;;  %v2626_v38 = vld [vmem:[%s3429_s17 + $0xf0] sm:$0xff]  }
 0x9d3   :  { %v2592_v43 = vpop.f32.mrf.mxu0 }
 0x9d4   :  { %1372 = vmatmul.mubr.bf16.vlgmr.msra.gmra.mxu0 %v3116_v39  ;;  %1413 = vmatmul.mubr.bf16.vlgmr.msra.gmra.mxu1 %v3116_v39  ;;  %v2631_v43 = vld [vmem:[%s3429_s17 + $0x28] sm:$0xff]  }
 0x9d5   :  { %1422 = vmatpush1.bf16.msra.mxu0 %v2297_v30  ;;  %1463 = vmatpush1.bf16.msra.mxu1 %v2299_v31  ;;  %v909_v47 = vpop.f32.mrf.mxu0  ;;  %v2244_v30 = vcombine.high %v916_v24, %v920_v25  ;;  %v2241_v31 = vcombine.low %v915_v20, %v919_v23 }
 0x9d6   :  { %1423 = vmatprep.subr.bf16.mxu0 %v2290_v40  ;;  %1464 = vmatprep.subr.bf16.mxu1 %v2292_v41  ;;  %v2627_v40 = vld [vmem:[%s3429_s17 + $0x30] sm:$0xff]   ;;  %v2635_v47 = vld [vmem:[%s3429_s17 + $0x20] sm:$0xff]  }
 0x9d7   :  { %v2593_v53 = vpop.f32.mrf.mxu0  ;;  %1453 = vmatprep.mubr.bf16.mxu0 %v2699_v33  ;;  %1494 = vmatprep.mubr.bf16.mxu1 %v2699_v33  ;;  %v2621_v33 = vld [vmem:[%s3429_s17 + $0x78] sm:$0xff]   ;;  %v2628_v41 = vld [vmem:[%s3429_s17 + $0xb0] sm:$0xff]  }
 0x9d8   :  { %v2641_v53 = vld [vmem:[%s3429_s17 + $0x50] sm:$0xff]  }
 0x9d9   :  { %1424 = vmatpush1.bf16.msra.mxu0 %v2289_v48  ;;  %1465 = vmatpush1.bf16.msra.mxu1 %v2291_v49  ;;  %v2636_v48 = vld [vmem:[%s3429_s17 + $0xa0] sm:$0xff]   ;;  %v2637_v49 = vld [vmem:[%s3429_s17 + $0x58] sm:$0xff]  }
 0x9da   :  { %1425 = vmatprep.subr.bf16.mxu0 %v2282_v50  ;;  %1466 = vmatprep.subr.bf16.mxu1 %v2284_v51  ;;  %v2638_v50 = vld [vmem:[%s3429_s17 + $0xd8] sm:$0xff]  }
 0x9db   :  { %v2639_v51 = vld [vmem:[%s3429_s17 + $0x18] sm:$0xff]  }
 0x9dd   :  { %1426 = vmatpush1.bf16.msra.mxu0 %v2281_v57  ;;  %1467 = vmatpush1.bf16.msra.mxu1 %v2283_v58  ;;  %v2645_v57 = vld [vmem:[%s3429_s17 + $0x48] sm:$0xff]  }
 0x9de   :  { %1427 = vmatprep.subr.bf16.mxu0 %v2274_v59  ;;  %1468 = vmatprep.subr.bf16.mxu1 %v2276_v60  ;;  %v2646_v58 = vld [vmem:[%s3429_s17 + $0xc8] sm:$0xff]  }
 0x9df   :  { %v2647_v59 = vld [vmem:[%s3429_s17 + $0x8] sm:$0xff]  }
 0x9e0   :  { %v2648_v60 = vld [vmem:[%s3429_s17 + $0x88] sm:$0xff]  }
 0x9e1   :  { %1428 = vmatpush1.bf16.msra.mxu0 %v2273_v2  ;;  %1469 = vmatpush1.bf16.msra.mxu1 %v2275_v3  ;;  %v2653_v2 = vld [vmem:[%s3429_s17 + $0x178] sm:$0xff]  }
 0x9e2   :  { %1429 = vmatprep.subr.bf16.mxu0 %v2266_v4  ;;  %1470 = vmatprep.subr.bf16.mxu1 %v2268_v5  ;;  %v2654_v3 = vld [vmem:[%s3429_s17 + $0x1f8] sm:$0xff]   ;;  %v989_v4 = vsub.s32 2, %v2854_v21  ;;  %v3300_v5 = vld [vmem:[%s3430_s16] sm:$0xff] }
 0x9e3   :  { %v982_v8 = vrot.slane %v3300_v5, %v2857_v22 }
 0x9e4   :  { %v990_v9 = vrot.slane %v3300_v5, %v989_v4  ;;  %v2681_v4 = vld [vmem:[%s3429_s17 + $0x140] sm:$0xff]  }
 0x9e5   :  { %1430 = vmatpush1.bf16.msra.mxu0 %v2265_v27  ;;  %1471 = vmatpush1.bf16.msra.mxu1 %v2267_v10  ;;  %v986_v27 = vrot.slane %v3300_v5, %v985_v6  ;;  %v994_v10 = vrot.slane %v3300_v5, %v993_v7 }
 0x9e6   :  { %1431 = vmatprep.subr.bf16.mxu0 %v2258_v11  ;;  %1472 = vmatprep.subr.bf16.mxu1 %v2260_v12 }
 0x9e9   :  { %1432 = vmatpush1.bf16.msra.mxu0 %v2257_v16  ;;  %1473 = vmatpush1.bf16.msra.mxu1 %v2259_v17 }
 0x9ea   :  { %1433 = vmatprep.subr.bf16.mxu0 %v2250_v18  ;;  %1474 = vmatprep.subr.bf16.mxu1 %v2252_v19 }
 0x9ed   :  { %1434 = vmatpush1.bf16.msra.mxu0 %v2249_v26  ;;  %1475 = vmatpush1.bf16.msra.mxu1 %v2251_v28 }
 0x9ee   :  { %1435 = vmatprep.subr.bf16.mxu0 %v2242_v29  ;;  %1476 = vmatprep.subr.bf16.mxu1 %v2244_v30  ;;  %v2655_v30 = vld [vmem:[%s3429_s17 + $0x138] sm:$0xff]  }
 0x9f1   :  { %1436 = vmatpush1.bf16.msra.mxu0 %v2241_v31  ;;  %1477 = vmatpush1.bf16.msra.mxu1 %v2243_v32  ;;  %v2656_v31 = vld [vmem:[%s3429_s17 + $0x1b8] sm:$0xff]  }
 0x9f2   :  { %2407 = vmatprep.subr.bf16.mxu0 %v2621_v33  ;;  %2429 = vmatprep.subr.bf16.mxu1 %v2622_v34  ;;  %v2657_v34 = vld [vmem:[%s3429_s17 + $0x170] sm:$0xff]  }
 0x9f4   :  { %1454 = vmatmul.mubr.bf16.vlgmr.msra.gmra.mxu0 %v3116_v39  ;;  %1495 = vmatmul.mubr.bf16.vlgmr.msra.gmra.mxu1 %v3116_v39  ;;  %v2630_v39 = vld [vmem:[%s3429_s17 + $0xe8] sm:$0xff]  }
 0x9f5   :  { %2408 = vmatpush3.bf16.msra.mxu0 %v2623_v35  ;;  %2430 = vmatpush3.bf16.msra.mxu1 %v2624_v36  ;;  %v2658_v35 = vld [vmem:[%s3429_s17 + $0x1f0] sm:$0xff]  }
 0x9f6   :  { %2409 = vmatprep.subr.bf16.mxu0 %v2625_v37  ;;  %2431 = vmatprep.subr.bf16.mxu1 %v2626_v38  ;;  %v2659_v36 = vld [vmem:[%s3429_s17 + $0x130] sm:$0xff]   ;;  %v2661_v38 = vld [vmem:[%s3429_s17 + $0x168] sm:$0xff]  }
 0x9f7   :  { %v2660_v37 = vld [vmem:[%s3429_s17 + $0x1b0] sm:$0xff]  }
 0x9f9   :  { %2410 = vmatpush3.bf16.msra.mxu0 %v2627_v40  ;;  %2432 = vmatpush3.bf16.msra.mxu1 %v2628_v41  ;;  %v2662_v40 = vld [vmem:[%s3429_s17 + $0x1e8] sm:$0xff]  }
 0x9fa   :  { %2411 = vmatprep.subr.bf16.mxu0 %v2629_v42  ;;  %2433 = vmatprep.subr.bf16.mxu1 %v2630_v39  ;;  %v2663_v41 = vld [vmem:[%s3429_s17 + $0x128] sm:$0xff]   ;;  %v2665_v39 = vld [vmem:[%s3429_s17 + $0x160] sm:$0xff]  }
 0x9fb   :  { %v2664_v42 = vld [vmem:[%s3429_s17 + $0x1a8] sm:$0xff]  }
 0x9fd   :  { %2412 = vmatpush3.bf16.msra.mxu0 %v2631_v43  ;;  %2434 = vmatpush3.bf16.msra.mxu1 %v2632_v44  ;;  %v2666_v43 = vld [vmem:[%s3429_s17 + $0x1e0] sm:$0xff]  }
 0x9fe   :  { %2413 = vmatprep.subr.bf16.mxu0 %v2633_v45  ;;  %2435 = vmatprep.subr.bf16.mxu1 %v2634_v46  ;;  %v2667_v44 = vld [vmem:[%s3429_s17 + $0x120] sm:$0xff]   ;;  %v2669_v46 = vld [vmem:[%s3429_s17 + $0x158] sm:$0xff]  }
 0x9ff   :  { %v2668_v45 = vld [vmem:[%s3429_s17 + $0x1a0] sm:$0xff]  }
 0xa01   :  { %2414 = vmatpush3.bf16.msra.mxu0 %v2635_v47  ;;  %2436 = vmatpush3.bf16.msra.mxu1 %v2636_v48  ;;  %v2670_v47 = vld [vmem:[%s3429_s17 + $0x1d8] sm:$0xff]  }
 0xa02   :  { %2415 = vmatprep.subr.bf16.mxu0 %v2637_v49  ;;  %2437 = vmatprep.subr.bf16.mxu1 %v2638_v50  ;;  %v2671_v48 = vld [vmem:[%s3429_s17 + $0x118] sm:$0xff]   ;;  %v2673_v50 = vld [vmem:[%s3429_s17 + $0x150] sm:$0xff]  }
 0xa03   :  { %v2672_v49 = vld [vmem:[%s3429_s17 + $0x198] sm:$0xff]  }
 0xa05   :  { %2416 = vmatpush3.bf16.msra.mxu0 %v2639_v51  ;;  %2438 = vmatpush3.bf16.msra.mxu1 %v2640_v52  ;;  %v2674_v51 = vld [vmem:[%s3429_s17 + $0x1d0] sm:$0xff]   ;;  %v997_v52 = vsub.s32 4, %v2854_v21 }
 0xa06   :  { %2417 = vmatprep.subr.bf16.mxu0 %v2641_v53  ;;  %2439 = vmatprep.subr.bf16.mxu1 %v2642_v54  ;;  %v1005_v53 = vsub.s32 6, %v2854_v21  ;;  %v2675_v54 = vld [vmem:[%s3429_s17 + $0x110] sm:$0xff]  }
 0xa09   :  { %2418 = vmatpush3.bf16.msra.mxu0 %v2643_v55  ;;  %2440 = vmatpush3.bf16.msra.mxu1 %v2644_v56  ;;  %v2676_v55 = vld [vmem:[%s3429_s17 + $0x190] sm:$0xff]   ;;  %v1001_v56 = vsub.s32 5, %v2854_v21 }
 0xa0a   :  { %2419 = vmatprep.subr.bf16.mxu0 %v2645_v57  ;;  %2441 = vmatprep.subr.bf16.mxu1 %v2646_v58  ;;  %v1009_v57 = vsub.s32 7, %v2854_v21  ;;  %v2677_v58 = vld [vmem:[%s3429_s17 + $0x148] sm:$0xff]  }
 0xa0c   :  { %v1010_v21 = vrot.slane %v3300_v5, %v1009_v57 }
 0xa0d   :  { %2420 = vmatpush3.bf16.msra.mxu0 %v2647_v59  ;;  %2442 = vmatpush3.bf16.msra.mxu1 %v2648_v60  ;;  %v2678_v59 = vld [vmem:[%s3429_s17 + $0x1c8] sm:$0xff]   ;;  %v998_v60 = vrot.slane %v3300_v5, %v997_v52 }
 0xa0e   :  { %2421 = vmatprep.subr.bf16.mxu0 %v2649_v61  ;;  %2443 = vmatprep.subr.bf16.mxu1 %v2650_v62  ;;  %v1006_v61 = vrot.slane %v3300_v5, %v1005_v53  ;;  %v1002_v62 = vrot.slane %v3300_v5, %v1001_v56  ;;  %v2682_v5 = vld [vmem:[%s3429_s17 + $0x1c0] sm:$0xff]  }
 0xa11   :  { %2422 = vmatpush3.bf16.msra.mxu0 %v2651_v63  ;;  %2444 = vmatpush3.bf16.msra.mxu1 %v2652_v1  ;;  %v2679_v63 = vld [vmem:[%s3429_s17 + $0x108] sm:$0xff]  }
 0xa12   :  { %2451 = vmatprep.subr.bf16.mxu0 %v2653_v2  ;;  %2473 = vmatprep.subr.bf16.mxu1 %v2654_v3  ;;  %v2680_v1 = vld [vmem:[%s3429_s17 + $0x188] sm:$0xff]  }
 0xa94   :  { %v1373_v11 = vpop.f32.mrf.mxu0  ;;  %v1414_v12 = vpop.f32.mrf.mxu1 }
 0xa95   :  { %v1374_v0 = vadd.f32 %v1373_v11, %v982_v8  ;;  %v1415_v13 = vadd.f32 %v1414_v12, %v990_v9  ;;  %v2683_v11 = vld [vmem:[%s3429_s17 + $0x100] sm:$0xff]  }
 0xa96   :  { %v1375_v14 = vpop.f32.mrf.mxu0  ;;  %v1416_v15 = vpop.f32.mrf.mxu1  ;;  %v2684_v12 = vld [vmem:[%s3429_s17 + $0x180] sm:$0xff]  }
 0xa97   :  { %v1376_v16 = vadd.f32 %v1375_v14, %v986_v27  ;;  %v1417_v17 = vadd.f32 %v1416_v15, %v994_v10  ;;  %v1503_v18 = vmax.f32 %v1374_v0, 0.0  ;;  %v1505_v19 = vmax.f32 %v1415_v13, 0.0 }
 0xa98   :  { %v1377_v20 = vpop.f32.mrf.mxu0  ;;  %v1418_v23 = vpop.f32.mrf.mxu1 }
 0xa99   :  { %v1504_v24 = vmax.f32 %v1376_v16, 0.0  ;;  %v1506_v22 = vmax.f32 %v1417_v17, 0.0  ;;  %v1511_v32 = vpack.c.bf16 %v1503_v18, %v1503_v18  ;;  %v1513_v33 = vpack.c.bf16 %v1505_v19, %v1505_v19 }
 0xa9a   :  { %v1378_v25 = vpop.f32.mrf.mxu0  ;;  %v1419_v26 = vpop.f32.mrf.mxu1 }
 0xa9b   :  { %v1512_v28 = vpack.c.bf16 %v1504_v24, %v1504_v24  ;;  %v1514_v29 = vpack.c.bf16 %v1506_v22, %v1506_v22 }
 0xa9d   :  { %2070 = vmatprep.mubr.bf16.mxu0 %v1512_v28  ;;  %2110 = vmatprep.mubr.bf16.mxu1 %v1514_v29 }
 0xa9e   :  { %2071 = vmatmul.mubr.bf16.vlgmr.msra.gmra.mxu0 %v1511_v32  ;;  %2111 = vmatmul.mubr.bf16.vlgmr.msra.gmra.mxu1 %v1513_v33 }
 0xa9f   :  { %2452 = vmatpush3.bf16.msra.mxu0 %v2655_v30  ;;  %2474 = vmatpush3.bf16.msra.mxu1 %v2656_v31 }
 0xaa0   :  { %2453 = vmatprep.subr.bf16.mxu0 %v2657_v34  ;;  %2475 = vmatprep.subr.bf16.mxu1 %v2658_v35  ;;  %v2301_v35 = vld [vmem:[%s3431_s18] ss:$0 sm:$0xff] }
 0xaa3   :  { %2454 = vmatpush3.bf16.msra.mxu0 %v2659_v36  ;;  %2476 = vmatpush3.bf16.msra.mxu1 %v2660_v37 }
 0xaa4   :  { %2455 = vmatprep.subr.bf16.mxu0 %v2661_v38  ;;  %2477 = vmatprep.subr.bf16.mxu1 %v2662_v40 }
 0xaa7   :  { %2456 = vmatpush3.bf16.msra.mxu0 %v2663_v41  ;;  %2478 = vmatpush3.bf16.msra.mxu1 %v2664_v42 }
 0xaa8   :  { %2457 = vmatprep.subr.bf16.mxu0 %v2665_v39  ;;  %2479 = vmatprep.subr.bf16.mxu1 %v2666_v43 }
 0xaab   :  { %2458 = vmatpush3.bf16.msra.mxu0 %v2667_v44  ;;  %2480 = vmatpush3.bf16.msra.mxu1 %v2668_v45 }
 0xaac   :  { %2459 = vmatprep.subr.bf16.mxu0 %v2669_v46  ;;  %2481 = vmatprep.subr.bf16.mxu1 %v2670_v47 }
 0xaaf   :  { %2460 = vmatpush3.bf16.msra.mxu0 %v2671_v48  ;;  %2482 = vmatpush3.bf16.msra.mxu1 %v2672_v49 }
 0xab0   :  { %2461 = vmatprep.subr.bf16.mxu0 %v2673_v50  ;;  %2483 = vmatprep.subr.bf16.mxu1 %v2674_v51 }
 0xab3   :  { %2462 = vmatpush3.bf16.msra.mxu0 %v2675_v54  ;;  %2484 = vmatpush3.bf16.msra.mxu1 %v2676_v55 }
 0xab4   :  { %v1455_v2 = vpop.f32.mrf.mxu0  ;;  %v1496_v3 = vpop.f32.mrf.mxu1  ;;  %2463 = vmatprep.subr.bf16.mxu0 %v2677_v58  ;;  %2485 = vmatprep.subr.bf16.mxu1 %v2678_v59 }
 0xab5   :  { %v1456_v6 = vadd.f32 %v1455_v2, %v998_v60  ;;  %v1497_v7 = vadd.f32 %v1496_v3, %v1006_v61 }
 0xab6   :  { %v1457_v8 = vpop.f32.mrf.mxu0  ;;  %v1498_v9 = vpop.f32.mrf.mxu1 }
 0xab7   :  { %v1458_v27 = vadd.f32 %v1457_v8, %v1002_v62  ;;  %v1499_v10 = vadd.f32 %v1498_v9, %v1010_v21  ;;  %2464 = vmatpush3.bf16.msra.mxu0 %v2679_v63  ;;  %2486 = vmatpush3.bf16.msra.mxu1 %v2680_v1  ;;  %v1507_v0 = vmax.f32 %v1456_v6, 0.0  ;;  %v1509_v13 = vmax.f32 %v1497_v7, 0.0 }
 0xab8   :  { %v1459_v14 = vpop.f32.mrf.mxu0  ;;  %v1500_v15 = vpop.f32.mrf.mxu1  ;;  %2465 = vmatprep.subr.bf16.mxu0 %v2681_v4  ;;  %2487 = vmatprep.subr.bf16.mxu1 %v2682_v5 }
 0xab9   :  { %v1508_v16 = vmax.f32 %v1458_v27, 0.0  ;;  %v1510_v17 = vmax.f32 %v1499_v10, 0.0  ;;  %v1515_v24 = vpack.c.bf16 %v1507_v0, %v1507_v0  ;;  %v1517_v22 = vpack.c.bf16 %v1509_v13, %v1509_v13 }
 0xaba   :  { %v1460_v18 = vpop.f32.mrf.mxu0  ;;  %v1501_v19 = vpop.f32.mrf.mxu1 }
 0xabb   :  { %v1516_v20 = vpack.c.bf16 %v1508_v16, %v1508_v16  ;;  %v1518_v23 = vpack.c.bf16 %v1510_v17, %v1510_v17  ;;  %2466 = vmatpush3.bf16.msra.mxu0 %v2683_v11  ;;  %2488 = vmatpush3.bf16.msra.mxu1 %v2684_v12 }
 0xabd   :  { %2150 = vmatprep.mubr.bf16.mxu0 %v1516_v20  ;;  %2190 = vmatprep.mubr.bf16.mxu1 %v1518_v23 }
 0xabe   :  { %2151 = vmatmul.mubr.bf16.vlgmr.msra.gmra.mxu0 %v1515_v24  ;;  %2191 = vmatmul.mubr.bf16.vlgmr.msra.gmra.mxu1 %v1517_v22 }
 0xb5e   :  { %v2423_v25 = vpop.f32.mrf.mxu0  ;;  %v2445_v26 = vpop.f32.mrf.mxu1 }
 0xb60   :  { %v2424_v28 = vpop.f32.mrf.mxu0  ;;  %v2446_v29 = vpop.f32.mrf.mxu1 }
 0xb61   :  { %v2425_v34 = vadd.f32 %v2424_v28, %v2423_v25  ;;  %v2447_v40 = vadd.f32 %v2446_v29, %v2445_v26 }
 0xb62   :  { %v2426_v30 = vpop.f32.mrf.mxu0  ;;  %v2448_v31 = vpop.f32.mrf.mxu1 }
 0xb63   :  { %v2073_v36 = vadd.f32 %v2425_v34, %v2301_v35 }
 0xb64   :  { %v2427_v32 = vpop.f32.mrf.mxu0  ;;  %v2449_v33 = vpop.f32.mrf.mxu1 }
 0xb65   :  { %v2113_v39 = vadd.f32 %v2447_v40, %v2073_v36 }
 0xb7e   :  { %v2467_v37 = vpop.f32.mrf.mxu0  ;;  %v2489_v38 = vpop.f32.mrf.mxu1 }
 0xb80   :  { %v2468_v41 = vpop.f32.mrf.mxu0  ;;  %v2490_v42 = vpop.f32.mrf.mxu1 }
 0xb81   :  { %v2469_v43 = vadd.f32 %v2468_v41, %v2467_v37  ;;  %v2491_v47 = vadd.f32 %v2490_v42, %v2489_v38 }
 0xb82   :  { %v2470_v44 = vpop.f32.mrf.mxu0  ;;  %v2492_v45 = vpop.f32.mrf.mxu1 }
 0xb83   :  { %v2153_v46 = vadd.f32 %v2469_v43, %v2113_v39 }
 0xb84   :  { %v2471_v48 = vpop.f32.mrf.mxu0  ;;  %v2493_v49 = vpop.f32.mrf.mxu1 }
 0xb85   :  { %v2193_v50 = vadd.f32 %v2491_v47, %v2153_v46 }
 0xb87   :  { %2198 = vst [vmem:[%s3432_s19] sm:$0xff] %v2193_v50 }

</bundles_post_ra>
